<compile_context>
chip_gen: v7x
topology: tpu7x:2x2x1
jax: 0.10.0
libtpu: 0.0.40
codegen_flags: <defaults>
</compile_context>

<pallas_src>
import functools

import numpy as np
import jax
import jax.numpy as jnp
from jax import lax
from jax.experimental import pallas as pl
from jax.experimental.pallas import tpu as pltpu

K = 5
SIGMA = 0.1

# Per-input, per-pipeline-buffer DMA target: multi-MiB transfers land at
# ~85%+ of HBM roofline and amortize the ~0.35 us per-grid-step overhead.
_TARGET_DMA_BYTES = 8 * 1024 * 1024
_DEFAULT_VMEM_CAPACITY = 64 * 1024 * 1024   # conservative fallback (v7x per-TC)


def _gaussian_kernel(n: int, k: int = K, sigma: float = SIGMA) -> np.ndarray:
    """Deterministic smoothing kernel, same formula as the PyTorch module."""
    x = np.arange(-k, k + 1, dtype=np.float64)
    w = np.exp(-((x / n / sigma) ** 2) / 2.0)
    w = w / w.sum()
    return w.astype(np.float32)


def _conv_matrix(n: int, k: int = K, sigma: float = SIGMA) -> np.ndarray:
    """(N, N) banded matrix C with C[m, j] = kern[m - j + k] for |m - j| <= k.

    conv1d(true, kern, padding='same') == true @ C (zero 'same' padding baked
    in host-side), so the whole smoothing conv becomes one MXU matmul instead
    of an 11-tap roll/mask loop on the VPU/XLU.
    """
    kern = _gaussian_kernel(n, k, sigma)
    c = np.zeros((n, n), dtype=np.float32)
    for d in range(-k, k + 1):
        c += kern[d + k] * np.eye(n, k=-d, dtype=np.float32)
    return c


def _tpu_vmem_capacity_bytes(default: int = _DEFAULT_VMEM_CAPACITY) -> int:
    """Per-core VMEM capacity from the hardware, with a safe fallback."""
    try:
        cap = getattr(pltpu.get_tpu_info(), "vmem_capacity_bytes", None)
        if cap:
            return int(cap)
    except Exception:
        pass
    return default


def _num_tensorcores(default: int = 2) -> int:
    """Best-effort TensorCores-per-chip (v7x=2, v5e/v6e=1); default assumes 2
    (only affects the minimum grid-step count, harmless on single-TC chips)."""
    try:
        info = pltpu.get_tpu_info()
        for name in ("num_cores", "core_count", "num_tensorcores",
                     "tensorcores_per_chip"):
            v = getattr(info, name, None)
            if v:
                return int(v)
    except Exception:
        pass
    try:
        v = getattr(jax.devices()[0], "num_cores", None)
        if v:
            return int(v)
    except Exception:
        pass
    return default


def _pick_row_tile(b: int, n: int, itemsize: int, vmem_budget_bytes: int,
                   num_cores: int,
                   target_dma_bytes: int = _TARGET_DMA_BYTES) -> int:
    """Byte-based row tile: grow each double-buffered input tile toward
    ~target_dma_bytes while fitting the VMEM budget, then keep a core-count
    aware minimum number of grid steps for pipelining / megacore work."""
    row_bytes = n * itemsize
    # pred + true, double-buffered; conv matrix budgeted at 2 buffers
    # (worst case, if the single-buffer request is not honored).
    conv_bytes = 2 * n * n * 4
    fit_rows = (vmem_budget_bytes - conv_bytes) // (2 * 2 * row_bytes)
    dma_rows = target_dma_bytes // row_bytes
    tb = min(fit_rows, dma_rows, b)
    tb = max(tb - tb % 8, 8)
    tb = min(tb, b)
    while b % tb:
        tb -= 8
    # v7x (2 TCs) wants >= 4 steps (work for both cores + pipeline depth);
    # single-TC chips only need >= 3 steps for double-buffer overlap.
    min_steps = 4 if num_cores >= 2 else 3
    if b // tb < min_steps and b >= min_steps * 8:
        tb = max((b // min_steps) // 8 * 8, 8)
        while b % tb:
            tb -= 8
    return int(tb)


def _sce_kernel(pred_ref, true_ref, conv_ref, out_ref, *,
                inv_log_n, log_clip, precision):
    # Upcast on load: bf16 inputs halve HBM bytes of this mem-bound kernel;
    # f32 inputs make this a no-op.
    pred = pred_ref[...].astype(jnp.float32)      # (TB, N)
    true = true_ref[...].astype(jnp.float32)      # (TB, N)
    conv = conv_ref[...]                          # (N, N), resident

    # ---- smoothing conv on the MXU ----
    # DEFAULT precision = single bf16 pass with f32 accumulation (review fix:
    # HIGHEST made this a 6-pass matmul and flipped the kernel MXU-bound).
    w_raw = jnp.dot(true, conv, preferred_element_type=jnp.float32,
                    precision=precision)          # (TB, N)

    # ---- F.normalize(p=1) denominator, deferred to a per-row scalar ----
    l1 = jnp.sum(jnp.abs(w_raw), axis=-1, keepdims=True)          # (TB, 1)

    # ---- log(clip(softmax(pred), 1e-9, 1)) via logsumexp ----
    # softmax <= 1, so only the lower clip is live; applied in log space.
    m = jnp.max(pred, axis=-1, keepdims=True)                     # (TB, 1)
    s = jnp.sum(jnp.exp(pred - m), axis=-1, keepdims=True)        # (TB, 1)
    logp = jnp.maximum(pred - m - jnp.log(s), log_clip)           # (TB, N)

    # ---- weighted negative sum, normalized per row by l1 and log(N) ----
    raw = jnp.sum(w_raw * logp, axis=-1, keepdims=True)           # (TB, 1)
    loss = -(raw / jnp.maximum(l1, 1e-12)) * inv_log_n
    out_ref[...] = loss.astype(out_ref.dtype)


def smoothed_cross_entropy_distance(pred: jax.Array, true: jax.Array,
                                    *, k: int = K, sigma: float = SIGMA,
                                    tb: int | None = None,
                                    precision=None) -> jax.Array:
    assert pred.shape == true.shape and pred.ndim == 2
    b, n = pred.shape
    assert b % 8 == 0, "batch must be a multiple of 8 (f32 sublane tiling)"

    vmem_capacity = _tpu_vmem_capacity_bytes()
    vmem_budget = (3 * vmem_capacity) // 4     # ~75% of capacity for our tiles
    vmem_limit = (9 * vmem_capacity) // 10     # ~90%: headroom for compiler scratch
    num_cores = _num_tensorcores()

    itemsize = max(jnp.dtype(pred.dtype).itemsize, jnp.dtype(true.dtype).itemsize)
    if tb is None:
        tb = _pick_row_tile(b, n, itemsize, vmem_budget, num_cores)
    assert b % tb == 0

    conv_mat = jnp.asarray(_conv_matrix(n, k, sigma))
    inv_log_n = float(1.0 / np.log(n))
    log_clip = float(np.log(1e-9))

    kernel = functools.partial(_sce_kernel, inv_log_n=inv_log_n,
                               log_clip=log_clip, precision=precision)

    # TODO(synk): for vocab-scale N the dense (N, N) conv matrix is O(N^2) in
    # VMEM and FLOPs; switch to a banded/chunked conv (per-chunk strip with a
    # k-halo, or in-kernel 11-tap shift-add) plus online-softmax accumulators
    # over an N-chunk grid axis instead of extending this matrix.
    def build(conv_single_buffer: bool):
        conv_spec = pl.BlockSpec((n, n), lambda i: (0, 0))
        if conv_single_buffer and hasattr(pl, "Buffered"):
            try:
                # Constant index_map -> block stays resident; one pipeline
                # buffer is enough and saves N^2*4 bytes of VMEM (matters on
                # v7x's 64 MiB per-TC VMEM at larger N).
                conv_spec = pl.BlockSpec((n, n), lambda i: (0, 0),
                                         pipeline_mode=pl.Buffered(1))
            except TypeError:
                pass
        return pl.pallas_call(
            kernel,
            out_shape=jax.ShapeDtypeStruct((b, 1), jnp.float32),
            grid_spec=pltpu.PrefetchScalarGridSpec(
                num_scalar_prefetch=0,
                grid=(b // tb,),
                in_specs=[
                    pl.BlockSpec((tb, n), lambda i: (i, 0)),
                    pl.BlockSpec((tb, n), lambda i: (i, 0)),
                    conv_spec,
                ],
                out_specs=pl.BlockSpec((tb, 1), lambda i: (i, 0)),
            ),
            compiler_params=pltpu.CompilerParams(
                dimension_semantics=("parallel",),
                vmem_limit_bytes=int(vmem_limit)),
        )

    try:
        out = build(conv_single_buffer=True)(pred, true, conv_mat)
    except Exception:
        # pl.Buffered(1) not supported by this jax/Mosaic version; the default
        # double-buffered resident block is functionally identical, it just
        # spends an extra N^2*4 bytes of VMEM.
        out = build(conv_single_buffer=False)(pred, true, conv_mat)
    return out[:, 0]


def _reference(pred, true, k=K, sigma=SIGMA):
    """Pure-JAX (f32) reference matching the PyTorch forward."""
    b, n = pred.shape
    kern = jnp.asarray(_gaussian_kernel(n, k, sigma))
    padded = jnp.pad(true, ((0, 0), (k, k)))
    w = jnp.zeros_like(true)
    for i in range(2 * k + 1):
        w = w + kern[i] * lax.dynamic_slice_in_dim(padded, i, n, axis=1)
    w = w / jnp.maximum(jnp.sum(jnp.abs(w), axis=-1, keepdims=True), 1e-12)
    p = jax.nn.softmax(pred, axis=-1)
    logp = jnp.log(jnp.clip(p, 1e-9, 1.0))
    return -jnp.sum(w * logp, axis=-1) / jnp.log(float(n))


if __name__ == "__main__":
    key = jax.random.PRNGKey(0)
    kp, kt = jax.random.split(key)
    B, N = 256, 128
    pred = jax.random.normal(kp, (B, N), dtype=jnp.float32)
    # target is a nonnegative per-row distribution
    true = jax.nn.softmax(jax.random.normal(kt, (B, N), dtype=jnp.float32), axis=-1)

    loss = smoothed_cross_entropy_distance(pred, true)
    jax.block_until_ready(loss)

    ref = _reference(pred, true)
    # DEFAULT matmul precision runs the smoothing conv as a single bf16 MXU
    # pass (f32 accumulate); tolerance reflects that.  Passing
    # precision=lax.Precision.HIGH restores ~1e-5 agreement and is still
    # HBM-bound at these shapes.
    np.testing.assert_allclose(np.asarray(loss), np.asarray(ref),
                               rtol=2e-3, atol=2e-3)

    print("KERNEL_OK")
</pallas_src>

<mosaic_0001>
module attributes {stable_mosaic.version = 11 : i64} {
  func.func @_sce_kernel(%arg0: i32, %arg1: memref<64x128xf32, #tpu.memory_space<vmem>>, %arg2: memref<64x128xf32, #tpu.memory_space<vmem>>, %arg3: memref<128x128xf32, #tpu.memory_space<vmem>>, %arg4: memref<64x1xf32, #tpu.memory_space<vmem>>) attributes {dimension_semantics = [#tpu.dimension_semantics<parallel>], iteration_bounds = array<i64: 4>, scalar_prefetch = 0 : i64, scratch_operands = 0 : i64, tpu.core_type = #tpu.core_type<tc>, window_params = [{transform_indices = @transform_0, window_bounds = array<i64: 64, 128>}, {transform_indices = @transform_1, window_bounds = array<i64: 64, 128>}, {pipeline_mode = #tpu.pipeline_mode<synchronous>, transform_indices = @transform_2, window_bounds = array<i64: 128, 128>}, {transform_indices = @transform_3, window_bounds = array<i64: 64, 1>}]} {
    %c0 = arith.constant 0 : index
    %c0_0 = arith.constant 0 : index
    %0 = vector.load %arg1[%c0, %c0_0] : memref<64x128xf32, #tpu.memory_space<vmem>>, vector<64x128xf32>
    %c0_1 = arith.constant 0 : index
    %c0_2 = arith.constant 0 : index
    %1 = vector.load %arg2[%c0_1, %c0_2] : memref<64x128xf32, #tpu.memory_space<vmem>>, vector<64x128xf32>
    %c0_3 = arith.constant 0 : index
    %c0_4 = arith.constant 0 : index
    %2 = vector.load %arg3[%c0_3, %c0_4] : memref<128x128xf32, #tpu.memory_space<vmem>>, vector<128x128xf32>
    %cst = arith.constant dense<0.000000e+00> : vector<64x128xf32>
    %3 = tpu.matmul %1, %2, %cst {dimension_numbers = #tpu.dot_dimension_numbers<[1], [0], [0], [1], [0, 0, 1, 1], [], []>} : vector<64x128xf32>, vector<128x128xf32>, vector<64x128xf32> -> vector<64x128xf32>
    %4 = math.absf %3 : vector<64x128xf32>
    %cst_5 = arith.constant dense<0.000000e+00> : vector<64xf32>
    %5 = vector.multi_reduction <add>, %4, %cst_5 [1] : vector<64x128xf32> to vector<64xf32>
    %6 = vector.shape_cast %5 : vector<64xf32> to vector<64x1xf32>
    %cst_6 = arith.constant dense<0xFF800000> : vector<64xf32>
    %7 = vector.multi_reduction <maximumf>, %0, %cst_6 [1] : vector<64x128xf32> to vector<64xf32>
    %8 = vector.shape_cast %7 : vector<64xf32> to vector<64x1xf32>
    %9 = vector.broadcast %8 : vector<64x1xf32> to vector<64x128xf32>
    %10 = arith.subf %0, %9 : vector<64x128xf32>
    %11 = math.exp %10 : vector<64x128xf32>
    %cst_7 = arith.constant dense<0.000000e+00> : vector<64xf32>
    %12 = vector.multi_reduction <add>, %11, %cst_7 [1] : vector<64x128xf32> to vector<64xf32>
    %13 = vector.shape_cast %12 : vector<64xf32> to vector<64x1xf32>
    %14 = vector.broadcast %8 : vector<64x1xf32> to vector<64x128xf32>
    %15 = arith.subf %0, %14 : vector<64x128xf32>
    %16 = math.log %13 : vector<64x1xf32>
    %17 = vector.broadcast %16 : vector<64x1xf32> to vector<64x128xf32>
    %18 = arith.subf %15, %17 : vector<64x128xf32>
    %cst_8 = arith.constant -20.7232666 : f32
    %19 = vector.broadcast %cst_8 : f32 to vector<64x128xf32>
    %20 = arith.maximumf %18, %19 : vector<64x128xf32>
    %21 = arith.mulf %3, %20 : vector<64x128xf32>
    %cst_9 = arith.constant dense<0.000000e+00> : vector<64xf32>
    %22 = vector.multi_reduction <add>, %21, %cst_9 [1] : vector<64x128xf32> to vector<64xf32>
    %23 = vector.shape_cast %22 : vector<64xf32> to vector<64x1xf32>
    %cst_10 = arith.constant 9.99999996E-13 : f32
    %24 = vector.broadcast %cst_10 : f32 to vector<64x1xf32>
    %25 = arith.maximumf %6, %24 : vector<64x1xf32>
    %26 = arith.divf %23, %25 : vector<64x1xf32>
    %cst_11 = arith.constant 0.000000e+00 : f32
    %27 = vector.broadcast %cst_11 : f32 to vector<64x1xf32>
    %28 = arith.subf %27, %26 : vector<64x1xf32>
    %cst_12 = arith.constant 0.206099287 : f32
    %29 = vector.broadcast %cst_12 : f32 to vector<64x1xf32>
    %30 = arith.mulf %28, %29 : vector<64x1xf32>
    %c0_13 = arith.constant 0 : index
    %c0_14 = arith.constant 0 : index
    %31 = vector.load %arg4[%c0_13, %c0_14] : memref<64x1xf32, #tpu.memory_space<vmem>>, vector<64x1xf32>
    tpu.vector_store %arg4[%c0_13, %c0_14], %30 {strides = array<i32>} : memref<64x1xf32, #tpu.memory_space<vmem>>, vector<64x1xf32>,
    return
  }
  func.func @transform_0(%arg0: i32) -> (i32, i32) {
    %c0_i32 = arith.constant 0 : i32
    %c0_i32_0 = arith.constant 0 : i32
    return %arg0, %c0_i32 : i32, i32
  }
  func.func @transform_1(%arg0: i32) -> (i32, i32) {
    %c0_i32 = arith.constant 0 : i32
    %c0_i32_0 = arith.constant 0 : i32
    return %arg0, %c0_i32 : i32, i32
  }
  func.func @transform_2(%arg0: i32) -> (i32, i32) {
    %c0_i32 = arith.constant 0 : i32
    %c0_i32_0 = arith.constant 0 : i32
    %c0_i32_1 = arith.constant 0 : i32
    return %c0_i32, %c0_i32_0 : i32, i32
  }
  func.func @transform_3(%arg0: i32) -> (i32, i32) {
    %c0_i32 = arith.constant 0 : i32
    %c0_i32_0 = arith.constant 0 : i32
    return %arg0, %c0_i32 : i32, i32
  }
}

module attributes {stable_mosaic.version = 11 : i64} {
  func.func @_sce_kernel(%arg0: i32, %arg1: memref<64x128xf32, #tpu.memory_space<vmem>>, %arg2: memref<64x128xf32, #tpu.memory_space<vmem>>, %arg3: memref<128x128xf32, #tpu.memory_space<vmem>>, %arg4: memref<64x1xf32, #tpu.memory_space<vmem>>) attributes {dimension_semantics = [#tpu.dimension_semantics<parallel>], iteration_bounds = array<i64: 4>, scalar_prefetch = 0 : i64, scratch_operands = 0 : i64, tpu.core_type = #tpu.core_type<tc>, window_params = [{transform_indices = @transform_0, window_bounds = array<i64: 64, 128>}, {transform_indices = @transform_1, window_bounds = array<i64: 64, 128>}, {pipeline_mode = #tpu.pipeline_mode<synchronous>, transform_indices = @transform_2, window_bounds = array<i64: 128, 128>}, {transform_indices = @transform_3, window_bounds = array<i64: 64, 1>}]} {
    %c0 = arith.constant 0 : index
    %c0_0 = arith.constant 0 : index
    %0 = vector.load %arg1[%c0, %c0_0] : memref<64x128xf32, #tpu.memory_space<vmem>>, vector<64x128xf32>
    %c0_1 = arith.constant 0 : index
    %c0_2 = arith.constant 0 : index
    %1 = vector.load %arg2[%c0_1, %c0_2] : memref<64x128xf32, #tpu.memory_space<vmem>>, vector<64x128xf32>
    %c0_3 = arith.constant 0 : index
    %c0_4 = arith.constant 0 : index
    %2 = vector.load %arg3[%c0_3, %c0_4] : memref<128x128xf32, #tpu.memory_space<vmem>>, vector<128x128xf32>
    %cst = arith.constant dense<0.000000e+00> : vector<64x128xf32>
    %3 = tpu.matmul %1, %2, %cst {dimension_numbers = #tpu.dot_dimension_numbers<[1], [0], [0], [1], [0, 0, 1, 1], [], []>} : vector<64x128xf32>, vector<128x128xf32>, vector<64x128xf32> -> vector<64x128xf32>
    %4 = math.absf %3 : vector<64x128xf32>
    %cst_5 = arith.constant dense<0.000000e+00> : vector<64xf32>
    %5 = vector.multi_reduction <add>, %4, %cst_5 [1] : vector<64x128xf32> to vector<64xf32>
    %6 = vector.shape_cast %5 : vector<64xf32> to vector<64x1xf32>
    %cst_6 = arith.constant dense<0xFF800000> : vector<64xf32>
    %7 = vector.multi_reduction <maximumf>, %0, %cst_6 [1] : vector<64x128xf32> to vector<64xf32>
    %8 = vector.shape_cast %7 : vector<64xf32> to vector<64x1xf32>
    %9 = vector.broadcast %8 : vector<64x1xf32> to vector<64x128xf32>
    %10 = arith.subf %0, %9 : vector<64x128xf32>
    %11 = math.exp %10 : vector<64x128xf32>
    %cst_7 = arith.constant dense<0.000000e+00> : vector<64xf32>
    %12 = vector.multi_reduction <add>, %11, %cst_7 [1] : vector<64x128xf32> to vector<64xf32>
    %13 = vector.shape_cast %12 : vector<64xf32> to vector<64x1xf32>
    %14 = vector.broadcast %8 : vector<64x1xf32> to vector<64x128xf32>
    %15 = arith.subf %0, %14 : vector<64x128xf32>
    %16 = math.log %13 : vector<64x1xf32>
    %17 = vector.broadcast %16 : vector<64x1xf32> to vector<64x128xf32>
    %18 = arith.subf %15, %17 : vector<64x128xf32>
    %cst_8 = arith.constant -20.7232666 : f32
    %19 = vector.broadcast %cst_8 : f32 to vector<64x128xf32>
    %20 = arith.maximumf %18, %19 : vector<64x128xf32>
    %21 = arith.mulf %3, %20 : vector<64x128xf32>
    %cst_9 = arith.constant dense<0.000000e+00> : vector<64xf32>
    %22 = vector.multi_reduction <add>, %21, %cst_9 [1] : vector<64x128xf32> to vector<64xf32>
    %23 = vector.shape_cast %22 : vector<64xf32> to vector<64x1xf32>
    %cst_10 = arith.constant 9.99999996E-13 : f32
    %24 = vector.broadcast %cst_10 : f32 to vector<64x1xf32>
    %25 = arith.maximumf %6, %24 : vector<64x1xf32>
    %26 = arith.divf %23, %25 : vector<64x1xf32>
    %cst_11 = arith.constant 0.000000e+00 : f32
    %27 = vector.broadcast %cst_11 : f32 to vector<64x1xf32>
    %28 = arith.subf %27, %26 : vector<64x1xf32>
    %cst_12 = arith.constant 0.206099287 : f32
    %29 = vector.broadcast %cst_12 : f32 to vector<64x1xf32>
    %30 = arith.mulf %28, %29 : vector<64x1xf32>
    %c0_13 = arith.constant 0 : index
    %c0_14 = arith.constant 0 : index
    %31 = vector.load %arg4[%c0_13, %c0_14] : memref<64x1xf32, #tpu.memory_space<vmem>>, vector<64x1xf32>
    tpu.vector_store %arg4[%c0_13, %c0_14], %30 {strides = array<i32>} : memref<64x1xf32, #tpu.memory_space<vmem>>, vector<64x1xf32>,
    return
  }
  func.func @transform_0(%arg0: i32) -> (i32, i32) {
    %c0_i32 = arith.constant 0 : i32
    %c0_i32_0 = arith.constant 0 : i32
    return %arg0, %c0_i32 : i32, i32
  }
  func.func @transform_1(%arg0: i32) -> (i32, i32) {
    %c0_i32 = arith.constant 0 : i32
    %c0_i32_0 = arith.constant 0 : i32
    return %arg0, %c0_i32 : i32, i32
  }
  func.func @transform_2(%arg0: i32) -> (i32, i32) {
    %c0_i32 = arith.constant 0 : i32
    %c0_i32_0 = arith.constant 0 : i32
    %c0_i32_1 = arith.constant 0 : i32
    return %c0_i32, %c0_i32_0 : i32, i32
  }
  func.func @transform_3(%arg0: i32) -> (i32, i32) {
    %c0_i32 = arith.constant 0 : i32
    %c0_i32_0 = arith.constant 0 : i32
    return %arg0, %c0_i32 : i32, i32
  }
}

</mosaic_0001>

<bundles_post_ra>
// kernel: tpu_custom_call.1
= control target key start
LH: loop header
LB: loop body
LE: loop exit
PB: predicated region body
PF: predicated region fallthrough
CT: control target
= control target key end

     0   :  { %8 = vsyncpa [#allocation3], 0  ;;  %s1378_s0 = inlined_call_operand.hbm [shape: f32[256,128], index: 0, kind: input, shape index: {}]   ;;  %s1379_s1 = inlined_call_operand.hbm [shape: f32[256,128], index: 1, kind: input, shape index: {}]   ;;  %s1380_s2 = inlined_call_operand.hbm [shape: f32[128,128], index: 2, kind: input, shape index: {}]   ;;  %s1381_s3 = inlined_call_operand.vmem [shape: f32[256,1], index: 3, kind: output, shape index: {}]  }
   0x1   :  { %10 = vsyncpa [#allocation3 + $0x1], 0 }
   0x2   :  { %11 = vsyncpa [#allocation5], 0 }
   0x3   :  { %13 = vsyncpa [#allocation5 + $0x1], 0  ;;  %s1068_s12 = smov 0   ;;  %s1070_s13 = smov 0  }
   0x4   :  { %s1072_s14 = smov 0   ;;  %s1074_s15 = smov 0  }
   0x5 LB: > { %s1087_s16 = sadd.s32 4294967295, %s1041_s15   ;;  %p39_p0 = scmp.ne.s32.totalorder %s1033_s13, %s1029_s12  ;;  %s1041_s15 = sphi %s1074_s15, %s1396_s15   ;;  %s1037_s14 = sphi %s1072_s14, %s1395_s14   ;;  %s1033_s13 = sphi %s1070_s13, %s1394_s13   ;;  %s1029_s12 = sphi %s1068_s12, %s1393_s12  }
   0x6   : > { %p1382_p1 = scmp.eq.s32.totalorder %s1087_s16, 0  ;;  %p671_p2 = scmp.ge.s32.totalorder %s1041_s15, 1 }
   0x7   : > { %p123_p3 = scmp.lt.s32.totalorder %s1041_s15, 5  ;;  %s1043_s19 = smov [#allocation6]  }
   0x8   : > { %p1095_p4 = por %p1382_p1, %p39_p0  ;;  %s135_s20 = sshll.u32 %s1043_s19, 4  ;;  %s136_s20 = int_to_ptr.vmem [resolvable:$true] %s135_s20 }
   0x9   : > { %p1099_p5 = pnand %p671_p2, %p123_p3  ;;  %s1112_s22 = sadd.s32 1, %s1041_s15  }
   0xa   : > { %s1385_s17 = scalar_select %p1095_p4, 1, 0 }
   0xb   : > { %s1386_s18 = scalar_select %p1099_p5, 1, 0 }
   0xc   : > { %p814_p6 = pneg %p1099_p5  ;;  %s26_s23 = sadd.s32 1, %s1037_s14 }
   0xd   : > { %s23_s24 = ssub.s32 %s1041_s15, %s1112_s22  ;;  %s911_s27 = scalar_lea.hbm %s1380_s2, 2048 }
   0xe   : > { %p1107_p7 = pnand %p814_p6, %p1382_p1  ;;  %p912_p8 = scmp.ne.s32.totalorder %s1380_s2, %s911_s27 }
   0xf   : > { %p918_p12 = scmp.lt.u32.totalorder %s911_s27, %s1380_s2 }
  0x10   : > { %p913_p9 = pneg %p1107_p7 }
  0x12   : > { %p914_p10 = pnand %p913_p9, %p912_p8 }
  0x14   : > { %p915_p11 = pneg %p914_p10 }
  0x16   : > { %p920_p13 = pnand %p918_p12, %p915_p11 }
  0x18   : > { %923 = shalt.err (!%p920_p13)
}
  0x19   : > { %s924_s5 = scalar_lea.vmem %s136_s20, 2048  ;;  %p932_p6 = scmp.lt.s32.totalorder %s136_s20, %s136_s20 }
  0x1a   : > { %p925_p0 = scmp.ne.s32.totalorder %s136_s20, %s924_s5  ;;  %p933_p1 = scmp.lt.s32.totalorder %s924_s5, %s924_s5 }
  0x1c   : > { %p927_p2 = pnand %p925_p0, %p913_p9  ;;  %p934_p4 = por %p933_p1, %p932_p6 }
  0x1e   : > { %p928_p3 = pneg %p927_p2 }
  0x20   : > { %p935_p5 = pnand %p934_p4, %p928_p3 }
  0x22   : > { %938 = shalt.err (!%p935_p5)
}
  0x23   : > { %s1044_s6 = smov 128   ;;  %s1045_s7 = smov 8  }
  0x24   : > { %817 = dma.hbm_to_vmem [thread:$0]  (!%p1107_p7), %s1380_s2, 2048, %s136_s20, [#allocation5], %s1044_s6, %s1044_s6, %s1045_s7  }
  0x25   : > { %p24_p1 = scmp.eq.s32.totalorder %s23_s24, 0  ;;  %p33_p4 = scmp.ne.s32.totalorder %s1037_s14, %s1033_s13 }
  0x26   : > { %p34_p5 = scmp.eq.s32.totalorder %s1041_s15, 0  ;;  %p826_p8 = scmp.lt.s32.totalorder %s1041_s15, 4 }
  0x27   : > { %s1141_s10 = scalar_select %p24_p1, %s1037_s14, %s26_s23  }
  0x28   : > { %p35_p9 = por %p34_p5, %p33_p4  ;;  %s149_s11 = sand.u32 1, %s1037_s14  }
  0x29   : > { %s674_s12 = sshll.u32 %s149_s11, 6  ;;  %s688_s19 = sshll.u32 %s1041_s15, 10 }
  0x2a   : > { %s1148_s21 = scalar_lea.hbm %s1378_s0, %s688_s19  ;;  %s153_s27 = scalar_lea.vmem [#allocation2], %s674_s12 }
  0x2b   : > { %s160_s20 = sshll.u32 %s153_s27, 4  ;;  %p1152_p7 = pnand %p826_p8, %p35_p9  ;;  %s1150_s20 = int_to_ptr.vmem [resolvable:$true] %s160_s20 }
  0x2c   : > { %s1159_s29 = scalar_lea.hbm %s1379_s1, %s688_s19  ;;  %s174_s30 = scalar_lea.vmem [#allocation4], %s674_s12 }
  0x2d   : > { %s1161_s4 = sshll.u32 %s174_s30, 4  ;;  %s1163_s5 = scalar_lea.sflag [#allocation3], %s149_s11  ;;  %s1195_s4 = int_to_ptr.vmem [resolvable:$true] %s1161_s4 }
  0x2e   : > { %s939_s8 = scalar_lea.hbm %s1148_s21, 1024  ;;  %p941_p11 = pneg %p1152_p7 }
  0x2f   : > { %p940_p10 = scmp.ne.s32.totalorder %s1148_s21, %s939_s8  ;;  %s944_s26 = scalar_lea.hbm %s1378_s0, 4096 }
  0x30   : > { %p945_p0 = scmp.lt.u32.totalorder %s1148_s21, %s1378_s0  ;;  %p946_p2 = scmp.lt.u32.totalorder %s944_s26, %s939_s8 }
  0x31   : > { %p942_p12 = pnand %p941_p11, %p940_p10  ;;  %p948_p6 = scmp.lt.u32.totalorder %s939_s8, %s1148_s21 }
  0x32   : > { %p947_p3 = por %p946_p2, %p945_p0 }
  0x33   : > { %p943_p13 = pneg %p942_p12 }
  0x34   : > { %p949_p1 = por %p948_p6, %p947_p3 }
  0x36   : > { %p950_p4 = pnand %p949_p1, %p943_p13 }
  0x38   : > { %953 = shalt.err (!%p950_p4)
}
  0x39   : > { %s954_s11 = scalar_lea.vmem %s1150_s20, 1024  ;;  %s1046_s12 = smov [#allocation2]  }
  0x3a   : > { %p955_p5 = scmp.ne.s32.totalorder %s1150_s20, %s954_s11  ;;  %s959_s24 = sshll.u32 %s1046_s12, 4  ;;  %s960_s24 = int_to_ptr.vmem [resolvable:$false] %s959_s24 }
  0x3b   : > { %s961_s28 = scalar_lea.vmem %s960_s24, 2048  ;;  %p962_p10 = scmp.lt.s32.totalorder %s1150_s20, %s960_s24 }
  0x3c   : > { %p957_p8 = pnand %p955_p5, %p941_p11  ;;  %p963_p12 = scmp.lt.s32.totalorder %s961_s28, %s954_s11 }
  0x3e   : > { %p958_p9 = pneg %p957_p8  ;;  %p964_p0 = por %p963_p12, %p962_p10 }
  0x40   : > { %p965_p2 = pnand %p964_p0, %p958_p9 }
  0x42   : > { %968 = shalt.err (!%p965_p2)
}
  0x43   : > { %821 = dma.hbm_to_vmem [thread:$0]  (!%p1152_p7), %s1148_s21, 1024, %s1150_s20, %s1163_s5, %s1044_s6, %s1044_s6, %s1045_s7  }
  0x44   : > { %s170_s30 = sand.u32 1, %s1041_s15   ;;  %s969_s9 = scalar_lea.hbm %s1159_s29, 1024 }
  0x45   : > { %s1198_s8 = scalar_lea.sflag [#allocation5], %s170_s30  ;;  %p970_p13 = scmp.ne.s32.totalorder %s1159_s29, %s969_s9 }
  0x46   : > { %s974_s27 = scalar_lea.hbm %s1379_s1, 4096  ;;  %p975_p1 = scmp.lt.u32.totalorder %s1159_s29, %s1379_s1 }
  0x47   : > { %p972_p3 = pnand %p970_p13, %p941_p11  ;;  %p976_p4 = scmp.lt.u32.totalorder %s974_s27, %s969_s9 }
  0x48   : > { %p978_p8 = scmp.lt.u32.totalorder %s969_s9, %s1159_s29 }
  0x49   : > { %p973_p6 = pneg %p972_p3  ;;  %p977_p5 = por %p976_p4, %p975_p1 }
  0x4b   : > { %p979_p9 = por %p978_p8, %p977_p5 }
  0x4d   : > { %p980_p10 = pnand %p979_p9, %p973_p6 }
  0x4f   : > { %983 = shalt.err (!%p980_p10)
}
  0x50   : > { %s984_s15 = scalar_lea.vmem %s1195_s4, 1024  ;;  %s1047_s21 = smov [#allocation4]  }
  0x51   : > { %p985_p12 = scmp.ne.s32.totalorder %s1195_s4, %s984_s15  ;;  %s989_s20 = sshll.u32 %s1047_s21, 4  ;;  %s990_s20 = int_to_ptr.vmem [resolvable:$false] %s989_s20 }
  0x52   : > { %s991_s5 = scalar_lea.vmem %s990_s20, 2048  ;;  %p992_p13 = scmp.lt.s32.totalorder %s1195_s4, %s990_s20 }
  0x53   : > { %p987_p0 = pnand %p985_p12, %p941_p11  ;;  %p993_p3 = scmp.lt.s32.totalorder %s991_s5, %s984_s15 }
  0x55   : > { %p988_p2 = pneg %p987_p0  ;;  %p994_p1 = por %p993_p3, %p992_p13 }
  0x57   : > { %p995_p4 = pnand %p994_p1, %p988_p2 }
  0x59   : > { %998 = shalt.err (!%p995_p4)
}
  0x5a   : > { %824 = dma.hbm_to_vmem [thread:$0]  (!%p1152_p7), %s1159_s29, 1024, %s1195_s4, %s1198_s8, %s1044_s6, %s1044_s6, %s1045_s7  }
  0x5b   : > { %p1389_p11 = scmp.ne.s32.totalorder %s1386_s18, 0 }
  0x5c   : > { %s195_s12 = sand.u32 (!%p1389_p11), 1, %s1033_s13   ;;  %p1390_p6 = scmp.ne.s32.totalorder (!%p1389_p11), %s1385_s17, 0 }
  0x5d   : > { %193 = sbr.rel (%p1389_p11) target bundleno = 591 (0x24f), region = 32  ;;  %s681_s24 = sshll.u32 (!%p1389_p11), %s195_s12, 6 }
  0x5e   : > { %s196_s28 = scalar_lea.sflag (!%p1389_p11), [#allocation3], %s195_s12  ;;  %s1230_s30 = scalar_lea.vmem (!%p1389_p11), [#allocation2], %s681_s24 }
  0x64   : > { %1016 = dma.done.wait (%p1390_p6), %s196_s28, 1024  }
  0x65   : > { %1018 = vsyncadd (%p1390_p6), %s196_s28, 4294966272  ;;  %s204_s23 = sand.u32 1, %s1087_s16   ;;  %s1237_s6 = scalar_lea.vmem [#allocation4], %s681_s24 }
  0x66   : > { %s205_s9 = scalar_lea.sflag [#allocation5], %s204_s23 }
  0x67   : > { %1020 = dma.done.wait (%p1390_p6), %s205_s9, 1024  }
  0x68   : > { %1022 = vsyncadd (%p1390_p6), %s205_s9, 4294966272  ;;  %p1391_p7 = scmp.eq.s32.totalorder %s1087_s16, 0 }
  0x6a   : > { %1024 = dma.done.wait (%p1391_p7), [#allocation5], 2048   ;;  %p1392_p5 = pmov %p1391_p7 }
  0x6b   : > { %v1248_v0 = vld [vmem:[%s1230_s30] sm:$0xff]  ;;  %v1251_v1 = vld [vmem:[%s1230_s30 + $0x10] sm:$0xff]  ;;  %v1256_v2 = vld [vmem:[%s1230_s30 + $0x8] sm:$0xff]  ;;  %s684_s17 = sshll.u32 %s1087_s16, 3  ;;  %vm561_vm0 = vcmask 7168  }
  0x6c   : > { %1026 = vsyncadd (%p1392_p5), [#allocation5], 4294965248  ;;  %409 = vmax.xlane.f32.xlu0 %v1248_v0  ;;  %413 = vmax.xlane.f32.xlu1 %v1251_v1  ;;  %v1259_v3 = vld [vmem:[%s1230_s30 + $0x18] sm:$0xff]  ;;  %v264_v4 = vld [vmem:[#allocation6] sm:$0xff]  ;;  %p243_p8 = scmp.lt.s32.totalorder %s684_s17, 31 }
  0x6d   : > { %v265_v5 = vld [vmem:[#allocation6 + $0x8] sm:$0xff]  ;;  %v266_v6 = vld [vmem:[#allocation6 + $0x10] sm:$0xff]  ;;  %v267_v7 = vld [vmem:[#allocation6 + $0x18] sm:$0xff] }
  0x6e   : > { %v758_v8 = vpack.c.bf16 %v265_v5, %v264_v4  ;;  %v762_v9 = vpack.c.bf16 %v267_v7, %v266_v6  ;;  %v268_v10 = vld [vmem:[#allocation6 + $0x20] sm:$0xff]  ;;  %v269_v11 = vld [vmem:[#allocation6 + $0x28] sm:$0xff]  ;;  %v270_v17 = vld [vmem:[#allocation6 + $0x30] sm:$0xff]  ;;  %s1398_s17 = smov (!%p243_p8, %s684_s17), 31 }
  0x6f   : > { %v1264_v12 = vld [vmem:[%s1230_s30 + $0x20] sm:$0xff]  ;;  %v1267_v13 = vld [vmem:[%s1230_s30 + $0x28] sm:$0xff]  ;;  %v766_v14 = vpack.c.bf16 %v269_v11, %v268_v10  ;;  %v271_v18 = vld [vmem:[#allocation6 + $0x38] sm:$0xff]  ;;  %s685_s18 = sshll.u32 %s1398_s17, 3 }
  0x70   : > { %411 = vmax.xlane.f32.xlu0 %v1256_v2  ;;  %415 = vmax.xlane.f32.xlu1 %v1259_v3  ;;  %v256_v15 = vld [vmem:[%s1237_s6] sm:$0xff]  ;;  %v1274_v19 = vld [vmem:[%s1230_s30 + $0x30] sm:$0xff]  ;;  %v1277_v20 = vld [vmem:[%s1230_s30 + $0x38] sm:$0xff]  ;;  %v770_v21 = vpack.c.bf16 %v271_v18, %v270_v17  ;;  %s1347_s29 = scalar_lea.vmem %s1381_s3, %s685_s18 }
  0x71   : > { %759 = vmatprep.subr.bf16.mxu0 %v758_v8  ;;  %790 = vmatprep.subr.bf16.mxu1 %v758_v8  ;;  %v260_v16 = vld [vmem:[%s1237_s6 + $0x20] sm:$0xff]  ;;  %v273_v23 = vld [vmem:[#allocation6 + $0x48] sm:$0xff]  ;;  %v274_v25 = vld [vmem:[#allocation6 + $0x50] sm:$0xff] }
  0x72   : > { %761 = vmatpush3.bf16.msra.mxu0 %v758_v8  ;;  %798 = vmatpush3.bf16.msra.mxu1 %v758_v8  ;;  %v272_v22 = vld [vmem:[#allocation6 + $0x40] sm:$0xff]  ;;  %v275_v26 = vld [vmem:[#allocation6 + $0x58] sm:$0xff]  ;;  %v277_v29 = vld [vmem:[#allocation6 + $0x68] sm:$0xff] }
  0x73   : > { %763 = vmatprep.subr.bf16.mxu0 %v762_v9  ;;  %791 = vmatprep.subr.bf16.mxu1 %v762_v9  ;;  %v774_v24 = vpack.c.bf16 %v273_v23, %v272_v22  ;;  %v778_v27 = vpack.c.bf16 %v275_v26, %v274_v25  ;;  %v276_v28 = vld [vmem:[#allocation6 + $0x60] sm:$0xff]  ;;  %v278_v31 = vld [vmem:[#allocation6 + $0x70] sm:$0xff]  ;;  %v279_v32 = vld [vmem:[#allocation6 + $0x78] sm:$0xff] }
  0x74   : > { %417 = vmax.xlane.f32.xlu0 %v1264_v12  ;;  %419 = vmax.xlane.f32.xlu1 %v1267_v13  ;;  %v782_v30 = vpack.c.bf16 %v277_v29, %v276_v28  ;;  %v786_v33 = vpack.c.bf16 %v279_v32, %v278_v31  ;;  %v257_v34 = vld [vmem:[%s1237_s6 + $0x8] sm:$0xff]  ;;  %v258_v36 = vld [vmem:[%s1237_s6 + $0x10] sm:$0xff]  ;;  %v259_v38 = vld [vmem:[%s1237_s6 + $0x18] sm:$0xff] }
  0x75   : > { %746 = vmatprep.mubr.f32.mxu0 %v256_v15  ;;  %752 = vmatprep.mubr.f32.mxu1 %v260_v16  ;;  %v261_v35 = vld [vmem:[%s1237_s6 + $0x28] sm:$0xff]  ;;  %v262_v37 = vld [vmem:[%s1237_s6 + $0x30] sm:$0xff]  ;;  %v263_v39 = vld [vmem:[%s1237_s6 + $0x38] sm:$0xff] }
  0x76   : > { %765 = vmatpush3.bf16.msra.mxu0 %v762_v9  ;;  %799 = vmatpush3.bf16.msra.mxu1 %v762_v9 }
  0x77   : > { %767 = vmatprep.subr.bf16.mxu0 %v766_v14  ;;  %792 = vmatprep.subr.bf16.mxu1 %v766_v14 }
  0x78   : > { %421 = vmax.xlane.f32.xlu0 %v1274_v19  ;;  %423 = vmax.xlane.f32.xlu1 %v1277_v20 }
  0x7a   : > { %769 = vmatpush3.bf16.msra.mxu0 %v766_v14  ;;  %800 = vmatpush3.bf16.msra.mxu1 %v766_v14 }
  0x7b   : > { %771 = vmatprep.subr.bf16.mxu0 %v770_v21  ;;  %793 = vmatprep.subr.bf16.mxu1 %v770_v21 }
  0x7e   : > { %773 = vmatpush3.bf16.msra.mxu0 %v770_v21  ;;  %801 = vmatpush3.bf16.msra.mxu1 %v770_v21 }
  0x7f   : > { %775 = vmatprep.subr.bf16.mxu0 %v774_v24  ;;  %794 = vmatprep.subr.bf16.mxu1 %v774_v24 }
  0x82   : > { %777 = vmatpush3.bf16.msra.mxu0 %v774_v24  ;;  %802 = vmatpush3.bf16.msra.mxu1 %v774_v24 }
  0x83   : > { %779 = vmatprep.subr.bf16.mxu0 %v778_v27  ;;  %795 = vmatprep.subr.bf16.mxu1 %v778_v27 }
  0x86   : > { %781 = vmatpush3.bf16.msra.mxu0 %v778_v27  ;;  %803 = vmatpush3.bf16.msra.mxu1 %v778_v27 }
  0x87   : > { %783 = vmatprep.subr.bf16.mxu0 %v782_v30  ;;  %796 = vmatprep.subr.bf16.mxu1 %v782_v30 }
  0x8a   : > { %785 = vmatpush3.bf16.msra.mxu0 %v782_v30  ;;  %804 = vmatpush3.bf16.msra.mxu1 %v782_v30 }
  0x8b   : > { %787 = vmatprep.subr.bf16.mxu0 %v786_v33  ;;  %797 = vmatprep.subr.bf16.mxu1 %v786_v33 }
  0x8e   : > { %789 = vmatpush3.bf16.msra.mxu0 %v786_v33  ;;  %805 = vmatpush3.bf16.msra.mxu1 %v786_v33 }
  0x91   : > { %747 = vmatmul.mubr.f32.vlgmr.msra.gmra.mrb[0].mxu0 %v257_v34  ;;  %753 = vmatmul.mubr.f32.vlgmr.msra.gmra.mrb[0].mxu1 %v261_v35 }
  0x92   : > { %749 = vmatprep.mubr.f32.mxu0 %v258_v36  ;;  %755 = vmatprep.mubr.f32.mxu1 %v262_v37 }
  0x95   : > { %750 = vmatmul.mubr.f32.gmra.mrb[2].mxu0 %v259_v38  ;;  %756 = vmatmul.mubr.f32.gmra.mrb[2].mxu1 %v263_v39 }
  0xf9   : > { %v410_v40 = vpop.xlane.xlu0 %409  ;;  %v414_v41 = vpop.xlane.xlu1 %413 }
  0xfa   : > { %v1288_v42 = vsub.f32 %v1248_v0, %v410_v40  ;;  %v1291_v43 = vsub.f32 %v1251_v1, %v414_v41 }
  0xfc   : > { %v433_v44 = vmul.f32 1.442695, %v1288_v42  ;;  %v437_v45 = vmul.f32 1.442695, %v1291_v43 }
  0xfd   : > { %v412_v46 = vpop.xlane.xlu0 %411  ;;  %v416_v47 = vpop.xlane.xlu1 %415 }
  0xfe   : > { %863 = vpow2.f32 %v433_v44  ;;  %v1296_v48 = vsub.f32 %v1256_v2, %v412_v46  ;;  %v1299_v49 = vsub.f32 %v1259_v3, %v416_v47 }
  0xff   : > { %865 = vpow2.f32 %v437_v45 }
 0x100   : > { %v435_v50 = vmul.f32 1.442695, %v1296_v48  ;;  %v439_v51 = vmul.f32 1.442695, %v1299_v49 }
 0x101   : > { %v418_v52 = vpop.xlane.xlu0 %417  ;;  %v420_v53 = vpop.xlane.xlu1 %419 }
 0x102   : > { %867 = vpow2.f32 %v435_v50  ;;  %v1304_v54 = vsub.f32 %v1264_v12, %v418_v52  ;;  %v1307_v55 = vsub.f32 %v1267_v13, %v420_v53 }
 0x103   : > { %869 = vpow2.f32 %v439_v51 }
 0x104   : > { %v441_v56 = vmul.f32 1.442695, %v1304_v54  ;;  %v443_v57 = vmul.f32 1.442695, %v1307_v55 }
 0x105   : > { %v422_v58 = vpop.xlane.xlu0 %421  ;;  %v424_v59 = vpop.xlane.xlu1 %423 }
 0x106   : > { %871 = vpow2.f32 %v441_v56  ;;  %v1312_v60 = vsub.f32 %v1274_v19, %v422_v58  ;;  %v1315_v61 = vsub.f32 %v1277_v20, %v424_v59 }
 0x107   : > { %873 = vpow2.f32 %v443_v57 }
 0x108   : > { %v864_v62 = vpop.eup %863  ;;  %v445_v63 = vmul.f32 1.442695, %v1312_v60  ;;  %v447_v0 = vmul.f32 1.442695, %v1315_v61 }
 0x109   : > { %449 = vadd.xlane.f32.xlu0 %v864_v62  ;;  %v866_v1 = vpop.eup %865 }
 0x10a   : > { %875 = vpow2.f32 %v445_v63 }
 0x10b   : > { %877 = vpow2.f32 %v447_v0 }
 0x10c   : > { %v868_v2 = vpop.eup %867 }
 0x10d   : > { %453 = vadd.xlane.f32.xlu0 %v866_v1  ;;  %451 = vadd.xlane.f32.xlu1 %v868_v2  ;;  %v870_v3 = vpop.eup %869 }
 0x110   : > { %v872_v4 = vpop.eup %871 }
 0x111   : > { %455 = vadd.xlane.f32.xlu1 %v870_v3  ;;  %457 = vadd.xlane.f32.xlu0 %v872_v4  ;;  %v874_v5 = vpop.eup %873 }
 0x114   : > { %v876_v6 = vpop.eup %875 }
 0x115   : > { %459 = vadd.xlane.f32.xlu1 %v874_v5  ;;  %461 = vadd.xlane.f32.xlu0 %v876_v6  ;;  %v878_v7 = vpop.eup %877 }
 0x119   : > { %463 = vadd.xlane.f32.xlu1 %v878_v7 }
 0x164   : > { %v748_v8 = vpop.f32.mrb[0].mxu0  ;;  %v1319_v9 = vpop.f32.mrb[0].mxu1 }
 0x165   : > { %v346_v10 = vpop.f32.mrb[1].mxu0  ;;  %v1321_v11 = vpop.f32.mrb[1].mxu1  ;;  %v386_v12 = vand.u32 2147483647, %v748_v8  ;;  %v390_v14 = vand.u32 2147483647, %v1319_v9 }
 0x166   : > { %v385_v13 = vand.u32 2147483647, %v346_v10  ;;  %v389_v16 = vand.u32 2147483647, %v1321_v11 }
 0x167   : > { %395 = vadd.xlane.f32.xlu1 %v386_v12 }
 0x168   : > { %393 = vadd.xlane.f32.xlu0 %v385_v13  ;;  %v751_v15 = vpop.f32.mrb[2].mxu0  ;;  %v1325_v17 = vpop.f32.mrb[2].mxu1 }
 0x169   : > { %v356_v18 = vpop.f32.mrb[3].mxu0  ;;  %v1327_v19 = vpop.f32.mrb[3].mxu1  ;;  %v388_v20 = vand.u32 2147483647, %v751_v15  ;;  %v392_v22 = vand.u32 2147483647, %v1325_v17 }
 0x16a   : > { %v387_v21 = vand.u32 2147483647, %v356_v18  ;;  %v391_v23 = vand.u32 2147483647, %v1327_v19 }
 0x16b   : > { %403 = vadd.xlane.f32.xlu1 %v390_v14 }
 0x16c   : > { %401 = vadd.xlane.f32.xlu0 %v389_v16 }
 0x16f   : > { %399 = vadd.xlane.f32.xlu1 %v388_v20 }
 0x170   : > { %397 = vadd.xlane.f32.xlu0 %v387_v21 }
 0x173   : > { %407 = vadd.xlane.f32.xlu1 %v392_v22 }
 0x174   : > { %405 = vadd.xlane.f32.xlu0 %v391_v23 }
 0x196   : > { %v450_v24 = vpop.xlane.xlu0 %449 }
 0x197   : > { %879 = vlog2.f32 %v450_v24 }
 0x19a   : > { %v452_v25 = vpop.xlane.xlu1 %451  ;;  %v454_v26 = vpop.xlane.xlu0 %453 }
 0x19b   : > { %881 = vlog2.f32 %v452_v25 }
 0x19c   : > { %883 = vlog2.f32 %v454_v26 }
 0x19e   : > { %v456_v27 = vpop.xlane.xlu1 %455  ;;  %v458_v28 = vpop.xlane.xlu0 %457 }
 0x19f   : > { %885 = vlog2.f32 %v456_v27 }
 0x1a0   : > { %887 = vlog2.f32 %v458_v28 }
 0x1a1   : > { %v880_v29 = vpop.eup %879 }
 0x1a2   : > { %v466_v30 = vmul.f32 0.6931472, %v880_v29  ;;  %v460_v31 = vpop.xlane.xlu1 %459  ;;  %v462_v32 = vpop.xlane.xlu0 %461 }
 0x1a3   : > { %889 = vlog2.f32 %v460_v31 }
 0x1a4   : > { %891 = vlog2.f32 %v462_v32  ;;  %v481_v33 = vsub.f32 %v1288_v42, %v466_v30 }
 0x1a5   : > { %v882_v34 = vpop.eup %881 }
 0x1a6   : > { %v884_v35 = vpop.eup %883  ;;  %v468_v36 = vmul.f32 0.6931472, %v882_v34  ;;  %v464_v37 = vpop.xlane.xlu1 %463  ;;  %v489_v38 = vmax.f32 %v481_v33, -20.723267 }
 0x1a7   : > { %v470_v39 = vmul.f32 0.6931472, %v884_v35  ;;  %893 = vlog2.f32 %v464_v37 }
 0x1a8   : > { %v497_v40 = vmul.f32 %v489_v38, %v346_v10  ;;  %v482_v41 = vsub.f32 %v1296_v48, %v468_v36 }
 0x1a9   : > { %v886_v44 = vpop.eup %885  ;;  %v483_v45 = vsub.f32 %v1291_v43, %v470_v39 }
 0x1aa   : > { %v888_v46 = vpop.eup %887  ;;  %v472_v47 = vmul.f32 0.6931472, %v886_v44  ;;  %505 = vadd.xlane.f32.xlu0 %v497_v40  ;;  %v490_v50 = vmax.f32 %v482_v41, -20.723267 }
 0x1ab   : > { %v491_v51 = vmax.f32 %v483_v45, -20.723267  ;;  %v474_v52 = vmul.f32 0.6931472, %v888_v46 }
 0x1ac   : > { %v498_v42 = vmul.f32 %v748_v8, %v490_v50  ;;  %v484_v53 = vsub.f32 %v1299_v49, %v472_v47 }
 0x1ad   : > { %v890_v56 = vpop.eup %889  ;;  %v499_v57 = vmul.f32 %v491_v51, %v356_v18  ;;  %v485_v58 = vsub.f32 %v1304_v54, %v474_v52 }
 0x1ae   : > { %v892_v59 = vpop.eup %891  ;;  %v476_v62 = vmul.f32 0.6931472, %v890_v56  ;;  %507 = vadd.xlane.f32.xlu1 %v498_v42  ;;  %v492_v48 = vmax.f32 %v484_v53, -20.723267 }
 0x1af   : > { %v478_v63 = vmul.f32 0.6931472, %v892_v59  ;;  %509 = vadd.xlane.f32.xlu0 %v499_v57  ;;  %v493_v43 = vmax.f32 %v485_v58, -20.723267 }
 0x1b0   : > { %v500_v0 = vmul.f32 %v751_v15, %v492_v48  ;;  %v486_v1 = vsub.f32 %v1307_v55, %v476_v62 }
 0x1b1   : > { %v894_v2 = vpop.eup %893  ;;  %v487_v3 = vsub.f32 %v1312_v60, %v478_v63  ;;  %v501_v4 = vmul.f32 %v493_v43, %v1321_v11 }
 0x1b2   : > { %v480_v49 = vmul.f32 0.6931472, %v894_v2  ;;  %511 = vadd.xlane.f32.xlu1 %v500_v0  ;;  %v494_v5 = vmax.f32 %v486_v1, -20.723267 }
 0x1b3   : > { %v495_v6 = vmax.f32 %v487_v3, -20.723267  ;;  %513 = vadd.xlane.f32.xlu0 %v501_v4 }
 0x1b4   : > { %v502_v54 = vmul.f32 %v1319_v9, %v494_v5  ;;  %v488_v7 = vsub.f32 %v1315_v61, %v480_v49 }
 0x1b5   : > { %v503_v8 = vmul.f32 %v495_v6, %v1327_v19 }
 0x1b6   : > { %515 = vadd.xlane.f32.xlu1 %v502_v54  ;;  %v496_v10 = vmax.f32 %v488_v7, -20.723267 }
 0x1b7   : > { %517 = vadd.xlane.f32.xlu0 %v503_v8 }
 0x1b8   : > { %v504_v55 = vmul.f32 %v1325_v17, %v496_v10 }
 0x1ba   : > { %519 = vadd.xlane.f32.xlu1 %v504_v55 }
 0x1f4   : > { %v396_v11 = vpop.xlane.xlu1 %395 }
 0x1f5   : > { %v394_v60 = vpop.xlane.xlu0 %393  ;;  %v522_v18 = vmax.f32 %v396_v11, 1e-12 }
 0x1f6   : > { %v521_v14 = vmax.f32 %v394_v60, 1e-12 }
 0x1f8   : > { %v404_v13 = vpop.xlane.xlu1 %403  ;;  %895 = vrcp.f32 %v521_v14 }
 0x1f9   : > { %v402_v12 = vpop.xlane.xlu0 %401  ;;  %v526_v22 = vmax.f32 %v404_v13, 1e-12 }
 0x1fa   : > { %v525_v20 = vmax.f32 %v402_v12, 1e-12 }
 0x1fc   : > { %v400_v9 = vpop.xlane.xlu1 %399 }
 0x1fd   : > { %v398_v15 = vpop.xlane.xlu0 %397  ;;  %v524_v61 = vmax.f32 %v400_v9, 1e-12 }
 0x1fe   : > { %v523_v16 = vmax.f32 %v398_v15, 1e-12 }
 0x200   : > { %897 = vrcp.f32 %v523_v16  ;;  %v408_v23 = vpop.xlane.xlu1 %407 }
 0x201   : > { %899 = vrcp.f32 %v522_v18  ;;  %v406_v19 = vpop.xlane.xlu0 %405  ;;  %v528_v26 = vmax.f32 %v408_v23, 1e-12 }
 0x202   : > { %901 = vrcp.f32 %v524_v61  ;;  %v527_v17 = vmax.f32 %v406_v19, 1e-12  ;;  %v896_v21 = vpop.eup %895 }
 0x203   : > { %903 = vrcp.f32 %v525_v20 }
 0x204   : > { %905 = vrcp.f32 %v527_v17 }
 0x205   : > { %907 = vrcp.f32 %v526_v22 }
 0x206   : > { %909 = vrcp.f32 %v528_v26 }
 0x20a   : > { %v898_v27 = vpop.eup %897 }
 0x20b   : > { %v900_v29 = vpop.eup %899 }
 0x20c   : > { %v902_v34 = vpop.eup %901 }
 0x20d   : > { %v904_v39 = vpop.eup %903 }
 0x20e   : > { %v906_v47 = vpop.eup %905 }
 0x20f   : > { %v908_v51 = vpop.eup %907 }
 0x210   : > { %v910_v48 = vpop.eup %909 }
 0x237   : > { %v506_v24 = vpop.xlane.xlu0 %505 }
 0x238   : > { %v530_v25 = vmul.f32 %v896_v21, %v506_v24 }
 0x23a   : > { %v545_v28 = vsub.f32 0.0, %v530_v25 }
 0x23b   : > { %v508_v30 = vpop.xlane.xlu1 %507 }
 0x23c   : > { %v553_v31 = vmul.f32 0.20609929, %v545_v28  ;;  %v532_v32 = vmul.f32 %v900_v29, %v508_v30  ;;  %v510_v33 = vpop.xlane.xlu0 %509 }
 0x23d   : > { %v534_v35 = vmul.f32 %v898_v27, %v510_v33 }
 0x23e   : > { %562 = vst.msk [vmem:[%s1347_s29] sm:$0xff] %vm561_vm0, %v553_v31  ;;  %v546_v36 = vsub.f32 0.0, %v532_v32 }
 0x23f   : > { %v547_v37 = vsub.f32 0.0, %v534_v35  ;;  %v512_v38 = vpop.xlane.xlu1 %511 }
 0x240   : > { %v554_v40 = vmul.f32 0.20609929, %v546_v36  ;;  %v536_v41 = vmul.f32 %v902_v34, %v512_v38  ;;  %v514_v44 = vpop.xlane.xlu0 %513 }
 0x241   : > { %v555_v45 = vmul.f32 0.20609929, %v547_v37  ;;  %v538_v46 = vmul.f32 %v904_v39, %v514_v44 }
 0x242   : > { %563 = vst.msk [vmem:[%s1347_s29 + $0x8] sm:$0xff] %vm561_vm0, %v554_v40  ;;  %v548_v50 = vsub.f32 0.0, %v536_v41 }
 0x243   : > { %564 = vst.msk [vmem:[%s1347_s29 + $0x10] sm:$0xff] %vm561_vm0, %v555_v45  ;;  %v549_v52 = vsub.f32 0.0, %v538_v46  ;;  %v516_v42 = vpop.xlane.xlu1 %515 }
 0x244   : > { %v556_v53 = vmul.f32 0.20609929, %v548_v50  ;;  %v540_v56 = vmul.f32 %v908_v51, %v516_v42  ;;  %v518_v57 = vpop.xlane.xlu0 %517 }
 0x245   : > { %v557_v58 = vmul.f32 0.20609929, %v549_v52  ;;  %v542_v59 = vmul.f32 %v906_v47, %v518_v57 }
 0x246   : > { %565 = vst.msk [vmem:[%s1347_s29 + $0x18] sm:$0xff] %vm561_vm0, %v556_v53  ;;  %v550_v62 = vsub.f32 0.0, %v540_v56 }
 0x247   : > { %566 = vst.msk [vmem:[%s1347_s29 + $0x20] sm:$0xff] %vm561_vm0, %v557_v58  ;;  %v551_v63 = vsub.f32 0.0, %v542_v59  ;;  %v520_v43 = vpop.xlane.xlu1 %519 }
 0x248   : > { %v558_v0 = vmul.f32 0.20609929, %v550_v62  ;;  %v544_v1 = vmul.f32 %v910_v48, %v520_v43 }
 0x249   : > { %v559_v2 = vmul.f32 0.20609929, %v551_v63 }
 0x24a   : > { %567 = vst.msk [vmem:[%s1347_s29 + $0x28] sm:$0xff] %vm561_vm0, %v558_v0  ;;  %v552_v3 = vsub.f32 0.0, %v544_v1 }
 0x24b   : > { %568 = vst.msk [vmem:[%s1347_s29 + $0x30] sm:$0xff] %vm561_vm0, %v559_v2 }
 0x24c   : > { %v560_v4 = vmul.f32 0.20609929, %v552_v3 }
 0x24e   : > { %569 = vst.msk [vmem:[%s1347_s29 + $0x38] sm:$0xff] %vm561_vm0, %v560_v4 }
 0x24f PF: > { %p16_p9 = scmp.ge.s32.totalorder %s1112_s22, 6   ;;  %s1393_s12 = smov %s1033_s13 }
 0x250   : > { %s1394_s13 = smov %s1037_s14  ;;  %s1395_s14 = smov %s1141_s10 }
 0x251   : > { %s1396_s15 = smov %s1112_s22  ;;  %18 = sbr.rel (!%p16_p9) target bundleno = 5 (0x5), region = 89 }
 0x258   :  { %592 = vsyncpa [#allocation3], 1 }
 0x259   :  { %594 = vsyncpa [#allocation3 + $0x1], 1 }
 0x25a   :  { %595 = vsyncpa [#allocation5], 1 }
 0x25b   :  { %597 = vsyncpa [#allocation5 + $0x1], 1 }

// kernel: tpu_custom_call.1
= control target key start
LH: loop header
LB: loop body
LE: loop exit
PB: predicated region body
PF: predicated region fallthrough
CT: control target
= control target key end

     0   :  { %8 = vsyncpa [#allocation3], 0  ;;  %s1378_s0 = inlined_call_operand.hbm [shape: f32[256,128], index: 0, kind: input, shape index: {}]   ;;  %s1379_s1 = inlined_call_operand.hbm [shape: f32[256,128], index: 1, kind: input, shape index: {}]   ;;  %s1380_s2 = inlined_call_operand.hbm [shape: f32[128,128], index: 2, kind: input, shape index: {}]   ;;  %s1381_s3 = inlined_call_operand.vmem [shape: f32[256,1], index: 3, kind: output, shape index: {}]  }
   0x1   :  { %10 = vsyncpa [#allocation3 + $0x1], 0 }
   0x2   :  { %11 = vsyncpa [#allocation5], 0 }
   0x3   :  { %13 = vsyncpa [#allocation5 + $0x1], 0  ;;  %s1068_s12 = smov 0   ;;  %s1070_s13 = smov 0  }
   0x4   :  { %s1072_s14 = smov 0   ;;  %s1074_s15 = smov 0  }
   0x5 LB: > { %s1087_s16 = sadd.s32 4294967295, %s1041_s15   ;;  %p39_p0 = scmp.ne.s32.totalorder %s1033_s13, %s1029_s12  ;;  %s1041_s15 = sphi %s1074_s15, %s1396_s15   ;;  %s1037_s14 = sphi %s1072_s14, %s1395_s14   ;;  %s1033_s13 = sphi %s1070_s13, %s1394_s13   ;;  %s1029_s12 = sphi %s1068_s12, %s1393_s12  }
   0x6   : > { %p1382_p1 = scmp.eq.s32.totalorder %s1087_s16, 0  ;;  %p671_p2 = scmp.ge.s32.totalorder %s1041_s15, 1 }
   0x7   : > { %p123_p3 = scmp.lt.s32.totalorder %s1041_s15, 5  ;;  %s1043_s19 = smov [#allocation6]  }
   0x8   : > { %p1095_p4 = por %p1382_p1, %p39_p0  ;;  %s135_s20 = sshll.u32 %s1043_s19, 4  ;;  %s136_s20 = int_to_ptr.vmem [resolvable:$true] %s135_s20 }
   0x9   : > { %p1099_p5 = pnand %p671_p2, %p123_p3  ;;  %s1112_s22 = sadd.s32 1, %s1041_s15  }
   0xa   : > { %s1385_s17 = scalar_select %p1095_p4, 1, 0 }
   0xb   : > { %s1386_s18 = scalar_select %p1099_p5, 1, 0 }
   0xc   : > { %p814_p6 = pneg %p1099_p5  ;;  %s26_s23 = sadd.s32 1, %s1037_s14 }
   0xd   : > { %s23_s24 = ssub.s32 %s1041_s15, %s1112_s22  ;;  %s911_s27 = scalar_lea.hbm %s1380_s2, 2048 }
   0xe   : > { %p1107_p7 = pnand %p814_p6, %p1382_p1  ;;  %p912_p8 = scmp.ne.s32.totalorder %s1380_s2, %s911_s27 }
   0xf   : > { %p918_p12 = scmp.lt.u32.totalorder %s911_s27, %s1380_s2 }
  0x10   : > { %p913_p9 = pneg %p1107_p7 }
  0x12   : > { %p914_p10 = pnand %p913_p9, %p912_p8 }
  0x14   : > { %p915_p11 = pneg %p914_p10 }
  0x16   : > { %p920_p13 = pnand %p918_p12, %p915_p11 }
  0x18   : > { %923 = shalt.err (!%p920_p13)
}
  0x19   : > { %s924_s5 = scalar_lea.vmem %s136_s20, 2048  ;;  %p932_p6 = scmp.lt.s32.totalorder %s136_s20, %s136_s20 }
  0x1a   : > { %p925_p0 = scmp.ne.s32.totalorder %s136_s20, %s924_s5  ;;  %p933_p1 = scmp.lt.s32.totalorder %s924_s5, %s924_s5 }
  0x1c   : > { %p927_p2 = pnand %p925_p0, %p913_p9  ;;  %p934_p4 = por %p933_p1, %p932_p6 }
  0x1e   : > { %p928_p3 = pneg %p927_p2 }
  0x20   : > { %p935_p5 = pnand %p934_p4, %p928_p3 }
  0x22   : > { %938 = shalt.err (!%p935_p5)
}
  0x23   : > { %s1044_s6 = smov 128   ;;  %s1045_s7 = smov 8  }
  0x24   : > { %817 = dma.hbm_to_vmem [thread:$0]  (!%p1107_p7), %s1380_s2, 2048, %s136_s20, [#allocation5], %s1044_s6, %s1044_s6, %s1045_s7  }
  0x25   : > { %p24_p1 = scmp.eq.s32.totalorder %s23_s24, 0  ;;  %p33_p4 = scmp.ne.s32.totalorder %s1037_s14, %s1033_s13 }
  0x26   : > { %p34_p5 = scmp.eq.s32.totalorder %s1041_s15, 0  ;;  %p826_p8 = scmp.lt.s32.totalorder %s1041_s15, 4 }
  0x27   : > { %s1141_s10 = scalar_select %p24_p1, %s1037_s14, %s26_s23  }
  0x28   : > { %p35_p9 = por %p34_p5, %p33_p4  ;;  %s149_s11 = sand.u32 1, %s1037_s14  }
  0x29   : > { %s674_s12 = sshll.u32 %s149_s11, 6  ;;  %s688_s19 = sshll.u32 %s1041_s15, 10 }
  0x2a   : > { %s1148_s21 = scalar_lea.hbm %s1378_s0, %s688_s19  ;;  %s153_s27 = scalar_lea.vmem [#allocation2], %s674_s12 }
  0x2b   : > { %s160_s20 = sshll.u32 %s153_s27, 4  ;;  %p1152_p7 = pnand %p826_p8, %p35_p9  ;;  %s1150_s20 = int_to_ptr.vmem [resolvable:$true] %s160_s20 }
  0x2c   : > { %s1159_s29 = scalar_lea.hbm %s1379_s1, %s688_s19  ;;  %s174_s30 = scalar_lea.vmem [#allocation4], %s674_s12 }
  0x2d   : > { %s1161_s4 = sshll.u32 %s174_s30, 4  ;;  %s1163_s5 = scalar_lea.sflag [#allocation3], %s149_s11  ;;  %s1195_s4 = int_to_ptr.vmem [resolvable:$true] %s1161_s4 }
  0x2e   : > { %s939_s8 = scalar_lea.hbm %s1148_s21, 1024  ;;  %p941_p11 = pneg %p1152_p7 }
  0x2f   : > { %p940_p10 = scmp.ne.s32.totalorder %s1148_s21, %s939_s8  ;;  %s944_s26 = scalar_lea.hbm %s1378_s0, 4096 }
  0x30   : > { %p945_p0 = scmp.lt.u32.totalorder %s1148_s21, %s1378_s0  ;;  %p946_p2 = scmp.lt.u32.totalorder %s944_s26, %s939_s8 }
  0x31   : > { %p942_p12 = pnand %p941_p11, %p940_p10  ;;  %p948_p6 = scmp.lt.u32.totalorder %s939_s8, %s1148_s21 }
  0x32   : > { %p947_p3 = por %p946_p2, %p945_p0 }
  0x33   : > { %p943_p13 = pneg %p942_p12 }
  0x34   : > { %p949_p1 = por %p948_p6, %p947_p3 }
  0x36   : > { %p950_p4 = pnand %p949_p1, %p943_p13 }
  0x38   : > { %953 = shalt.err (!%p950_p4)
}
  0x39   : > { %s954_s11 = scalar_lea.vmem %s1150_s20, 1024  ;;  %s1046_s12 = smov [#allocation2]  }
  0x3a   : > { %p955_p5 = scmp.ne.s32.totalorder %s1150_s20, %s954_s11  ;;  %s959_s24 = sshll.u32 %s1046_s12, 4  ;;  %s960_s24 = int_to_ptr.vmem [resolvable:$false] %s959_s24 }
  0x3b   : > { %s961_s28 = scalar_lea.vmem %s960_s24, 2048  ;;  %p962_p10 = scmp.lt.s32.totalorder %s1150_s20, %s960_s24 }
  0x3c   : > { %p957_p8 = pnand %p955_p5, %p941_p11  ;;  %p963_p12 = scmp.lt.s32.totalorder %s961_s28, %s954_s11 }
  0x3e   : > { %p958_p9 = pneg %p957_p8  ;;  %p964_p0 = por %p963_p12, %p962_p10 }
  0x40   : > { %p965_p2 = pnand %p964_p0, %p958_p9 }
  0x42   : > { %968 = shalt.err (!%p965_p2)
}
  0x43   : > { %821 = dma.hbm_to_vmem [thread:$0]  (!%p1152_p7), %s1148_s21, 1024, %s1150_s20, %s1163_s5, %s1044_s6, %s1044_s6, %s1045_s7  }
  0x44   : > { %s170_s30 = sand.u32 1, %s1041_s15   ;;  %s969_s9 = scalar_lea.hbm %s1159_s29, 1024 }
  0x45   : > { %s1198_s8 = scalar_lea.sflag [#allocation5], %s170_s30  ;;  %p970_p13 = scmp.ne.s32.totalorder %s1159_s29, %s969_s9 }
  0x46   : > { %s974_s27 = scalar_lea.hbm %s1379_s1, 4096  ;;  %p975_p1 = scmp.lt.u32.totalorder %s1159_s29, %s1379_s1 }
  0x47   : > { %p972_p3 = pnand %p970_p13, %p941_p11  ;;  %p976_p4 = scmp.lt.u32.totalorder %s974_s27, %s969_s9 }
  0x48   : > { %p978_p8 = scmp.lt.u32.totalorder %s969_s9, %s1159_s29 }
  0x49   : > { %p973_p6 = pneg %p972_p3  ;;  %p977_p5 = por %p976_p4, %p975_p1 }
  0x4b   : > { %p979_p9 = por %p978_p8, %p977_p5 }
  0x4d   : > { %p980_p10 = pnand %p979_p9, %p973_p6 }
  0x4f   : > { %983 = shalt.err (!%p980_p10)
}
  0x50   : > { %s984_s15 = scalar_lea.vmem %s1195_s4, 1024  ;;  %s1047_s21 = smov [#allocation4]  }
  0x51   : > { %p985_p12 = scmp.ne.s32.totalorder %s1195_s4, %s984_s15  ;;  %s989_s20 = sshll.u32 %s1047_s21, 4  ;;  %s990_s20 = int_to_ptr.vmem [resolvable:$false] %s989_s20 }
  0x52   : > { %s991_s5 = scalar_lea.vmem %s990_s20, 2048  ;;  %p992_p13 = scmp.lt.s32.totalorder %s1195_s4, %s990_s20 }
  0x53   : > { %p987_p0 = pnand %p985_p12, %p941_p11  ;;  %p993_p3 = scmp.lt.s32.totalorder %s991_s5, %s984_s15 }
  0x55   : > { %p988_p2 = pneg %p987_p0  ;;  %p994_p1 = por %p993_p3, %p992_p13 }
  0x57   : > { %p995_p4 = pnand %p994_p1, %p988_p2 }
  0x59   : > { %998 = shalt.err (!%p995_p4)
}
  0x5a   : > { %824 = dma.hbm_to_vmem [thread:$0]  (!%p1152_p7), %s1159_s29, 1024, %s1195_s4, %s1198_s8, %s1044_s6, %s1044_s6, %s1045_s7  }
  0x5b   : > { %p1389_p11 = scmp.ne.s32.totalorder %s1386_s18, 0 }
  0x5c   : > { %s195_s12 = sand.u32 (!%p1389_p11), 1, %s1033_s13   ;;  %p1390_p6 = scmp.ne.s32.totalorder (!%p1389_p11), %s1385_s17, 0 }
  0x5d   : > { %193 = sbr.rel (%p1389_p11) target bundleno = 591 (0x24f), region = 32  ;;  %s681_s24 = sshll.u32 (!%p1389_p11), %s195_s12, 6 }
  0x5e   : > { %s196_s28 = scalar_lea.sflag (!%p1389_p11), [#allocation3], %s195_s12  ;;  %s1230_s30 = scalar_lea.vmem (!%p1389_p11), [#allocation2], %s681_s24 }
  0x64   : > { %1016 = dma.done.wait (%p1390_p6), %s196_s28, 1024  }
  0x65   : > { %1018 = vsyncadd (%p1390_p6), %s196_s28, 4294966272  ;;  %s204_s23 = sand.u32 1, %s1087_s16   ;;  %s1237_s6 = scalar_lea.vmem [#allocation4], %s681_s24 }
  0x66   : > { %s205_s9 = scalar_lea.sflag [#allocation5], %s204_s23 }
  0x67   : > { %1020 = dma.done.wait (%p1390_p6), %s205_s9, 1024  }
  0x68   : > { %1022 = vsyncadd (%p1390_p6), %s205_s9, 4294966272  ;;  %p1391_p7 = scmp.eq.s32.totalorder %s1087_s16, 0 }
  0x6a   : > { %1024 = dma.done.wait (%p1391_p7), [#allocation5], 2048   ;;  %p1392_p5 = pmov %p1391_p7 }
  0x6b   : > { %v1248_v0 = vld [vmem:[%s1230_s30] sm:$0xff]  ;;  %v1251_v1 = vld [vmem:[%s1230_s30 + $0x10] sm:$0xff]  ;;  %v1256_v2 = vld [vmem:[%s1230_s30 + $0x8] sm:$0xff]  ;;  %s684_s17 = sshll.u32 %s1087_s16, 3  ;;  %vm561_vm0 = vcmask 7168  }
  0x6c   : > { %1026 = vsyncadd (%p1392_p5), [#allocation5], 4294965248  ;;  %409 = vmax.xlane.f32.xlu0 %v1248_v0  ;;  %413 = vmax.xlane.f32.xlu1 %v1251_v1  ;;  %v1259_v3 = vld [vmem:[%s1230_s30 + $0x18] sm:$0xff]  ;;  %v264_v4 = vld [vmem:[#allocation6] sm:$0xff]  ;;  %p243_p8 = scmp.lt.s32.totalorder %s684_s17, 31 }
  0x6d   : > { %v265_v5 = vld [vmem:[#allocation6 + $0x8] sm:$0xff]  ;;  %v266_v6 = vld [vmem:[#allocation6 + $0x10] sm:$0xff]  ;;  %v267_v7 = vld [vmem:[#allocation6 + $0x18] sm:$0xff] }
  0x6e   : > { %v758_v8 = vpack.c.bf16 %v265_v5, %v264_v4  ;;  %v762_v9 = vpack.c.bf16 %v267_v7, %v266_v6  ;;  %v268_v10 = vld [vmem:[#allocation6 + $0x20] sm:$0xff]  ;;  %v269_v11 = vld [vmem:[#allocation6 + $0x28] sm:$0xff]  ;;  %v270_v17 = vld [vmem:[#allocation6 + $0x30] sm:$0xff]  ;;  %s1398_s17 = smov (!%p243_p8, %s684_s17), 31 }
  0x6f   : > { %v1264_v12 = vld [vmem:[%s1230_s30 + $0x20] sm:$0xff]  ;;  %v1267_v13 = vld [vmem:[%s1230_s30 + $0x28] sm:$0xff]  ;;  %v766_v14 = vpack.c.bf16 %v269_v11, %v268_v10  ;;  %v271_v18 = vld [vmem:[#allocation6 + $0x38] sm:$0xff]  ;;  %s685_s18 = sshll.u32 %s1398_s17, 3 }
  0x70   : > { %411 = vmax.xlane.f32.xlu0 %v1256_v2  ;;  %415 = vmax.xlane.f32.xlu1 %v1259_v3  ;;  %v256_v15 = vld [vmem:[%s1237_s6] sm:$0xff]  ;;  %v1274_v19 = vld [vmem:[%s1230_s30 + $0x30] sm:$0xff]  ;;  %v1277_v20 = vld [vmem:[%s1230_s30 + $0x38] sm:$0xff]  ;;  %v770_v21 = vpack.c.bf16 %v271_v18, %v270_v17  ;;  %s1347_s29 = scalar_lea.vmem %s1381_s3, %s685_s18 }
  0x71   : > { %759 = vmatprep.subr.bf16.mxu0 %v758_v8  ;;  %790 = vmatprep.subr.bf16.mxu1 %v758_v8  ;;  %v260_v16 = vld [vmem:[%s1237_s6 + $0x20] sm:$0xff]  ;;  %v273_v23 = vld [vmem:[#allocation6 + $0x48] sm:$0xff]  ;;  %v274_v25 = vld [vmem:[#allocation6 + $0x50] sm:$0xff] }
  0x72   : > { %761 = vmatpush3.bf16.msra.mxu0 %v758_v8  ;;  %798 = vmatpush3.bf16.msra.mxu1 %v758_v8  ;;  %v272_v22 = vld [vmem:[#allocation6 + $0x40] sm:$0xff]  ;;  %v275_v26 = vld [vmem:[#allocation6 + $0x58] sm:$0xff]  ;;  %v277_v29 = vld [vmem:[#allocation6 + $0x68] sm:$0xff] }
  0x73   : > { %763 = vmatprep.subr.bf16.mxu0 %v762_v9  ;;  %791 = vmatprep.subr.bf16.mxu1 %v762_v9  ;;  %v774_v24 = vpack.c.bf16 %v273_v23, %v272_v22  ;;  %v778_v27 = vpack.c.bf16 %v275_v26, %v274_v25  ;;  %v276_v28 = vld [vmem:[#allocation6 + $0x60] sm:$0xff]  ;;  %v278_v31 = vld [vmem:[#allocation6 + $0x70] sm:$0xff]  ;;  %v279_v32 = vld [vmem:[#allocation6 + $0x78] sm:$0xff] }
  0x74   : > { %417 = vmax.xlane.f32.xlu0 %v1264_v12  ;;  %419 = vmax.xlane.f32.xlu1 %v1267_v13  ;;  %v782_v30 = vpack.c.bf16 %v277_v29, %v276_v28  ;;  %v786_v33 = vpack.c.bf16 %v279_v32, %v278_v31  ;;  %v257_v34 = vld [vmem:[%s1237_s6 + $0x8] sm:$0xff]  ;;  %v258_v36 = vld [vmem:[%s1237_s6 + $0x10] sm:$0xff]  ;;  %v259_v38 = vld [vmem:[%s1237_s6 + $0x18] sm:$0xff] }
  0x75   : > { %746 = vmatprep.mubr.f32.mxu0 %v256_v15  ;;  %752 = vmatprep.mubr.f32.mxu1 %v260_v16  ;;  %v261_v35 = vld [vmem:[%s1237_s6 + $0x28] sm:$0xff]  ;;  %v262_v37 = vld [vmem:[%s1237_s6 + $0x30] sm:$0xff]  ;;  %v263_v39 = vld [vmem:[%s1237_s6 + $0x38] sm:$0xff] }
  0x76   : > { %765 = vmatpush3.bf16.msra.mxu0 %v762_v9  ;;  %799 = vmatpush3.bf16.msra.mxu1 %v762_v9 }
  0x77   : > { %767 = vmatprep.subr.bf16.mxu0 %v766_v14  ;;  %792 = vmatprep.subr.bf16.mxu1 %v766_v14 }
  0x78   : > { %421 = vmax.xlane.f32.xlu0 %v1274_v19  ;;  %423 = vmax.xlane.f32.xlu1 %v1277_v20 }
  0x7a   : > { %769 = vmatpush3.bf16.msra.mxu0 %v766_v14  ;;  %800 = vmatpush3.bf16.msra.mxu1 %v766_v14 }
  0x7b   : > { %771 = vmatprep.subr.bf16.mxu0 %v770_v21  ;;  %793 = vmatprep.subr.bf16.mxu1 %v770_v21 }
  0x7e   : > { %773 = vmatpush3.bf16.msra.mxu0 %v770_v21  ;;  %801 = vmatpush3.bf16.msra.mxu1 %v770_v21 }
  0x7f   : > { %775 = vmatprep.subr.bf16.mxu0 %v774_v24  ;;  %794 = vmatprep.subr.bf16.mxu1 %v774_v24 }
  0x82   : > { %777 = vmatpush3.bf16.msra.mxu0 %v774_v24  ;;  %802 = vmatpush3.bf16.msra.mxu1 %v774_v24 }
  0x83   : > { %779 = vmatprep.subr.bf16.mxu0 %v778_v27  ;;  %795 = vmatprep.subr.bf16.mxu1 %v778_v27 }
  0x86   : > { %781 = vmatpush3.bf16.msra.mxu0 %v778_v27  ;;  %803 = vmatpush3.bf16.msra.mxu1 %v778_v27 }
  0x87   : > { %783 = vmatprep.subr.bf16.mxu0 %v782_v30  ;;  %796 = vmatprep.subr.bf16.mxu1 %v782_v30 }
  0x8a   : > { %785 = vmatpush3.bf16.msra.mxu0 %v782_v30  ;;  %804 = vmatpush3.bf16.msra.mxu1 %v782_v30 }
  0x8b   : > { %787 = vmatprep.subr.bf16.mxu0 %v786_v33  ;;  %797 = vmatprep.subr.bf16.mxu1 %v786_v33 }
  0x8e   : > { %789 = vmatpush3.bf16.msra.mxu0 %v786_v33  ;;  %805 = vmatpush3.bf16.msra.mxu1 %v786_v33 }
  0x91   : > { %747 = vmatmul.mubr.f32.vlgmr.msra.gmra.mrb[0].mxu0 %v257_v34  ;;  %753 = vmatmul.mubr.f32.vlgmr.msra.gmra.mrb[0].mxu1 %v261_v35 }
  0x92   : > { %749 = vmatprep.mubr.f32.mxu0 %v258_v36  ;;  %755 = vmatprep.mubr.f32.mxu1 %v262_v37 }
  0x95   : > { %750 = vmatmul.mubr.f32.gmra.mrb[2].mxu0 %v259_v38  ;;  %756 = vmatmul.mubr.f32.gmra.mrb[2].mxu1 %v263_v39 }
  0xf9   : > { %v410_v40 = vpop.xlane.xlu0 %409  ;;  %v414_v41 = vpop.xlane.xlu1 %413 }
  0xfa   : > { %v1288_v42 = vsub.f32 %v1248_v0, %v410_v40  ;;  %v1291_v43 = vsub.f32 %v1251_v1, %v414_v41 }
  0xfc   : > { %v433_v44 = vmul.f32 1.442695, %v1288_v42  ;;  %v437_v45 = vmul.f32 1.442695, %v1291_v43 }
  0xfd   : > { %v412_v46 = vpop.xlane.xlu0 %411  ;;  %v416_v47 = vpop.xlane.xlu1 %415 }
  0xfe   : > { %863 = vpow2.f32 %v433_v44  ;;  %v1296_v48 = vsub.f32 %v1256_v2, %v412_v46  ;;  %v1299_v49 = vsub.f32 %v1259_v3, %v416_v47 }
  0xff   : > { %865 = vpow2.f32 %v437_v45 }
 0x100   : > { %v435_v50 = vmul.f32 1.442695, %v1296_v48  ;;  %v439_v51 = vmul.f32 1.442695, %v1299_v49 }
 0x101   : > { %v418_v52 = vpop.xlane.xlu0 %417  ;;  %v420_v53 = vpop.xlane.xlu1 %419 }
 0x102   : > { %867 = vpow2.f32 %v435_v50  ;;  %v1304_v54 = vsub.f32 %v1264_v12, %v418_v52  ;;  %v1307_v55 = vsub.f32 %v1267_v13, %v420_v53 }
 0x103   : > { %869 = vpow2.f32 %v439_v51 }
 0x104   : > { %v441_v56 = vmul.f32 1.442695, %v1304_v54  ;;  %v443_v57 = vmul.f32 1.442695, %v1307_v55 }
 0x105   : > { %v422_v58 = vpop.xlane.xlu0 %421  ;;  %v424_v59 = vpop.xlane.xlu1 %423 }
 0x106   : > { %871 = vpow2.f32 %v441_v56  ;;  %v1312_v60 = vsub.f32 %v1274_v19, %v422_v58  ;;  %v1315_v61 = vsub.f32 %v1277_v20, %v424_v59 }
 0x107   : > { %873 = vpow2.f32 %v443_v57 }
 0x108   : > { %v864_v62 = vpop.eup %863  ;;  %v445_v63 = vmul.f32 1.442695, %v1312_v60  ;;  %v447_v0 = vmul.f32 1.442695, %v1315_v61 }
 0x109   : > { %449 = vadd.xlane.f32.xlu0 %v864_v62  ;;  %v866_v1 = vpop.eup %865 }
 0x10a   : > { %875 = vpow2.f32 %v445_v63 }
 0x10b   : > { %877 = vpow2.f32 %v447_v0 }
 0x10c   : > { %v868_v2 = vpop.eup %867 }
 0x10d   : > { %453 = vadd.xlane.f32.xlu0 %v866_v1  ;;  %451 = vadd.xlane.f32.xlu1 %v868_v2  ;;  %v870_v3 = vpop.eup %869 }
 0x110   : > { %v872_v4 = vpop.eup %871 }
 0x111   : > { %455 = vadd.xlane.f32.xlu1 %v870_v3  ;;  %457 = vadd.xlane.f32.xlu0 %v872_v4  ;;  %v874_v5 = vpop.eup %873 }
 0x114   : > { %v876_v6 = vpop.eup %875 }
 0x115   : > { %459 = vadd.xlane.f32.xlu1 %v874_v5  ;;  %461 = vadd.xlane.f32.xlu0 %v876_v6  ;;  %v878_v7 = vpop.eup %877 }
 0x119   : > { %463 = vadd.xlane.f32.xlu1 %v878_v7 }
 0x164   : > { %v748_v8 = vpop.f32.mrb[0].mxu0  ;;  %v1319_v9 = vpop.f32.mrb[0].mxu1 }
 0x165   : > { %v346_v10 = vpop.f32.mrb[1].mxu0  ;;  %v1321_v11 = vpop.f32.mrb[1].mxu1  ;;  %v386_v12 = vand.u32 2147483647, %v748_v8  ;;  %v390_v14 = vand.u32 2147483647, %v1319_v9 }
 0x166   : > { %v385_v13 = vand.u32 2147483647, %v346_v10  ;;  %v389_v16 = vand.u32 2147483647, %v1321_v11 }
 0x167   : > { %395 = vadd.xlane.f32.xlu1 %v386_v12 }
 0x168   : > { %393 = vadd.xlane.f32.xlu0 %v385_v13  ;;  %v751_v15 = vpop.f32.mrb[2].mxu0  ;;  %v1325_v17 = vpop.f32.mrb[2].mxu1 }
 0x169   : > { %v356_v18 = vpop.f32.mrb[3].mxu0  ;;  %v1327_v19 = vpop.f32.mrb[3].mxu1  ;;  %v388_v20 = vand.u32 2147483647, %v751_v15  ;;  %v392_v22 = vand.u32 2147483647, %v1325_v17 }
 0x16a   : > { %v387_v21 = vand.u32 2147483647, %v356_v18  ;;  %v391_v23 = vand.u32 2147483647, %v1327_v19 }
 0x16b   : > { %403 = vadd.xlane.f32.xlu1 %v390_v14 }
 0x16c   : > { %401 = vadd.xlane.f32.xlu0 %v389_v16 }
 0x16f   : > { %399 = vadd.xlane.f32.xlu1 %v388_v20 }
 0x170   : > { %397 = vadd.xlane.f32.xlu0 %v387_v21 }
 0x173   : > { %407 = vadd.xlane.f32.xlu1 %v392_v22 }
 0x174   : > { %405 = vadd.xlane.f32.xlu0 %v391_v23 }
 0x196   : > { %v450_v24 = vpop.xlane.xlu0 %449 }
 0x197   : > { %879 = vlog2.f32 %v450_v24 }
 0x19a   : > { %v452_v25 = vpop.xlane.xlu1 %451  ;;  %v454_v26 = vpop.xlane.xlu0 %453 }
 0x19b   : > { %881 = vlog2.f32 %v452_v25 }
 0x19c   : > { %883 = vlog2.f32 %v454_v26 }
 0x19e   : > { %v456_v27 = vpop.xlane.xlu1 %455  ;;  %v458_v28 = vpop.xlane.xlu0 %457 }
 0x19f   : > { %885 = vlog2.f32 %v456_v27 }
 0x1a0   : > { %887 = vlog2.f32 %v458_v28 }
 0x1a1   : > { %v880_v29 = vpop.eup %879 }
 0x1a2   : > { %v466_v30 = vmul.f32 0.6931472, %v880_v29  ;;  %v460_v31 = vpop.xlane.xlu1 %459  ;;  %v462_v32 = vpop.xlane.xlu0 %461 }
 0x1a3   : > { %889 = vlog2.f32 %v460_v31 }
 0x1a4   : > { %891 = vlog2.f32 %v462_v32  ;;  %v481_v33 = vsub.f32 %v1288_v42, %v466_v30 }
 0x1a5   : > { %v882_v34 = vpop.eup %881 }
 0x1a6   : > { %v884_v35 = vpop.eup %883  ;;  %v468_v36 = vmul.f32 0.6931472, %v882_v34  ;;  %v464_v37 = vpop.xlane.xlu1 %463  ;;  %v489_v38 = vmax.f32 %v481_v33, -20.723267 }
 0x1a7   : > { %v470_v39 = vmul.f32 0.6931472, %v884_v35  ;;  %893 = vlog2.f32 %v464_v37 }
 0x1a8   : > { %v497_v40 = vmul.f32 %v489_v38, %v346_v10  ;;  %v482_v41 = vsub.f32 %v1296_v48, %v468_v36 }
 0x1a9   : > { %v886_v44 = vpop.eup %885  ;;  %v483_v45 = vsub.f32 %v1291_v43, %v470_v39 }
 0x1aa   : > { %v888_v46 = vpop.eup %887  ;;  %v472_v47 = vmul.f32 0.6931472, %v886_v44  ;;  %505 = vadd.xlane.f32.xlu0 %v497_v40  ;;  %v490_v50 = vmax.f32 %v482_v41, -20.723267 }
 0x1ab   : > { %v491_v51 = vmax.f32 %v483_v45, -20.723267  ;;  %v474_v52 = vmul.f32 0.6931472, %v888_v46 }
 0x1ac   : > { %v498_v42 = vmul.f32 %v748_v8, %v490_v50  ;;  %v484_v53 = vsub.f32 %v1299_v49, %v472_v47 }
 0x1ad   : > { %v890_v56 = vpop.eup %889  ;;  %v499_v57 = vmul.f32 %v491_v51, %v356_v18  ;;  %v485_v58 = vsub.f32 %v1304_v54, %v474_v52 }
 0x1ae   : > { %v892_v59 = vpop.eup %891  ;;  %v476_v62 = vmul.f32 0.6931472, %v890_v56  ;;  %507 = vadd.xlane.f32.xlu1 %v498_v42  ;;  %v492_v48 = vmax.f32 %v484_v53, -20.723267 }
 0x1af   : > { %v478_v63 = vmul.f32 0.6931472, %v892_v59  ;;  %509 = vadd.xlane.f32.xlu0 %v499_v57  ;;  %v493_v43 = vmax.f32 %v485_v58, -20.723267 }
 0x1b0   : > { %v500_v0 = vmul.f32 %v751_v15, %v492_v48  ;;  %v486_v1 = vsub.f32 %v1307_v55, %v476_v62 }
 0x1b1   : > { %v894_v2 = vpop.eup %893  ;;  %v487_v3 = vsub.f32 %v1312_v60, %v478_v63  ;;  %v501_v4 = vmul.f32 %v493_v43, %v1321_v11 }
 0x1b2   : > { %v480_v49 = vmul.f32 0.6931472, %v894_v2  ;;  %511 = vadd.xlane.f32.xlu1 %v500_v0  ;;  %v494_v5 = vmax.f32 %v486_v1, -20.723267 }
 0x1b3   : > { %v495_v6 = vmax.f32 %v487_v3, -20.723267  ;;  %513 = vadd.xlane.f32.xlu0 %v501_v4 }
 0x1b4   : > { %v502_v54 = vmul.f32 %v1319_v9, %v494_v5  ;;  %v488_v7 = vsub.f32 %v1315_v61, %v480_v49 }
 0x1b5   : > { %v503_v8 = vmul.f32 %v495_v6, %v1327_v19 }
 0x1b6   : > { %515 = vadd.xlane.f32.xlu1 %v502_v54  ;;  %v496_v10 = vmax.f32 %v488_v7, -20.723267 }
 0x1b7   : > { %517 = vadd.xlane.f32.xlu0 %v503_v8 }
 0x1b8   : > { %v504_v55 = vmul.f32 %v1325_v17, %v496_v10 }
 0x1ba   : > { %519 = vadd.xlane.f32.xlu1 %v504_v55 }
 0x1f4   : > { %v396_v11 = vpop.xlane.xlu1 %395 }
 0x1f5   : > { %v394_v60 = vpop.xlane.xlu0 %393  ;;  %v522_v18 = vmax.f32 %v396_v11, 1e-12 }
 0x1f6   : > { %v521_v14 = vmax.f32 %v394_v60, 1e-12 }
 0x1f8   : > { %v404_v13 = vpop.xlane.xlu1 %403  ;;  %895 = vrcp.f32 %v521_v14 }
 0x1f9   : > { %v402_v12 = vpop.xlane.xlu0 %401  ;;  %v526_v22 = vmax.f32 %v404_v13, 1e-12 }
 0x1fa   : > { %v525_v20 = vmax.f32 %v402_v12, 1e-12 }
 0x1fc   : > { %v400_v9 = vpop.xlane.xlu1 %399 }
 0x1fd   : > { %v398_v15 = vpop.xlane.xlu0 %397  ;;  %v524_v61 = vmax.f32 %v400_v9, 1e-12 }
 0x1fe   : > { %v523_v16 = vmax.f32 %v398_v15, 1e-12 }
 0x200   : > { %897 = vrcp.f32 %v523_v16  ;;  %v408_v23 = vpop.xlane.xlu1 %407 }
 0x201   : > { %899 = vrcp.f32 %v522_v18  ;;  %v406_v19 = vpop.xlane.xlu0 %405  ;;  %v528_v26 = vmax.f32 %v408_v23, 1e-12 }
 0x202   : > { %901 = vrcp.f32 %v524_v61  ;;  %v527_v17 = vmax.f32 %v406_v19, 1e-12  ;;  %v896_v21 = vpop.eup %895 }
 0x203   : > { %903 = vrcp.f32 %v525_v20 }
 0x204   : > { %905 = vrcp.f32 %v527_v17 }
 0x205   : > { %907 = vrcp.f32 %v526_v22 }
 0x206   : > { %909 = vrcp.f32 %v528_v26 }
 0x20a   : > { %v898_v27 = vpop.eup %897 }
 0x20b   : > { %v900_v29 = vpop.eup %899 }
 0x20c   : > { %v902_v34 = vpop.eup %901 }
 0x20d   : > { %v904_v39 = vpop.eup %903 }
 0x20e   : > { %v906_v47 = vpop.eup %905 }
 0x20f   : > { %v908_v51 = vpop.eup %907 }
 0x210   : > { %v910_v48 = vpop.eup %909 }
 0x237   : > { %v506_v24 = vpop.xlane.xlu0 %505 }
 0x238   : > { %v530_v25 = vmul.f32 %v896_v21, %v506_v24 }
 0x23a   : > { %v545_v28 = vsub.f32 0.0, %v530_v25 }
 0x23b   : > { %v508_v30 = vpop.xlane.xlu1 %507 }
 0x23c   : > { %v553_v31 = vmul.f32 0.20609929, %v545_v28  ;;  %v532_v32 = vmul.f32 %v900_v29, %v508_v30  ;;  %v510_v33 = vpop.xlane.xlu0 %509 }
 0x23d   : > { %v534_v35 = vmul.f32 %v898_v27, %v510_v33 }
 0x23e   : > { %562 = vst.msk [vmem:[%s1347_s29] sm:$0xff] %vm561_vm0, %v553_v31  ;;  %v546_v36 = vsub.f32 0.0, %v532_v32 }
 0x23f   : > { %v547_v37 = vsub.f32 0.0, %v534_v35  ;;  %v512_v38 = vpop.xlane.xlu1 %511 }
 0x240   : > { %v554_v40 = vmul.f32 0.20609929, %v546_v36  ;;  %v536_v41 = vmul.f32 %v902_v34, %v512_v38  ;;  %v514_v44 = vpop.xlane.xlu0 %513 }
 0x241   : > { %v555_v45 = vmul.f32 0.20609929, %v547_v37  ;;  %v538_v46 = vmul.f32 %v904_v39, %v514_v44 }
 0x242   : > { %563 = vst.msk [vmem:[%s1347_s29 + $0x8] sm:$0xff] %vm561_vm0, %v554_v40  ;;  %v548_v50 = vsub.f32 0.0, %v536_v41 }
 0x243   : > { %564 = vst.msk [vmem:[%s1347_s29 + $0x10] sm:$0xff] %vm561_vm0, %v555_v45  ;;  %v549_v52 = vsub.f32 0.0, %v538_v46  ;;  %v516_v42 = vpop.xlane.xlu1 %515 }
 0x244   : > { %v556_v53 = vmul.f32 0.20609929, %v548_v50  ;;  %v540_v56 = vmul.f32 %v908_v51, %v516_v42  ;;  %v518_v57 = vpop.xlane.xlu0 %517 }
 0x245   : > { %v557_v58 = vmul.f32 0.20609929, %v549_v52  ;;  %v542_v59 = vmul.f32 %v906_v47, %v518_v57 }
 0x246   : > { %565 = vst.msk [vmem:[%s1347_s29 + $0x18] sm:$0xff] %vm561_vm0, %v556_v53  ;;  %v550_v62 = vsub.f32 0.0, %v540_v56 }
 0x247   : > { %566 = vst.msk [vmem:[%s1347_s29 + $0x20] sm:$0xff] %vm561_vm0, %v557_v58  ;;  %v551_v63 = vsub.f32 0.0, %v542_v59  ;;  %v520_v43 = vpop.xlane.xlu1 %519 }
 0x248   : > { %v558_v0 = vmul.f32 0.20609929, %v550_v62  ;;  %v544_v1 = vmul.f32 %v910_v48, %v520_v43 }
 0x249   : > { %v559_v2 = vmul.f32 0.20609929, %v551_v63 }
 0x24a   : > { %567 = vst.msk [vmem:[%s1347_s29 + $0x28] sm:$0xff] %vm561_vm0, %v558_v0  ;;  %v552_v3 = vsub.f32 0.0, %v544_v1 }
 0x24b   : > { %568 = vst.msk [vmem:[%s1347_s29 + $0x30] sm:$0xff] %vm561_vm0, %v559_v2 }
 0x24c   : > { %v560_v4 = vmul.f32 0.20609929, %v552_v3 }
 0x24e   : > { %569 = vst.msk [vmem:[%s1347_s29 + $0x38] sm:$0xff] %vm561_vm0, %v560_v4 }
 0x24f PF: > { %p16_p9 = scmp.ge.s32.totalorder %s1112_s22, 6   ;;  %s1393_s12 = smov %s1033_s13 }
 0x250   : > { %s1394_s13 = smov %s1037_s14  ;;  %s1395_s14 = smov %s1141_s10 }
 0x251   : > { %s1396_s15 = smov %s1112_s22  ;;  %18 = sbr.rel (!%p16_p9) target bundleno = 5 (0x5), region = 89 }
 0x258   :  { %592 = vsyncpa [#allocation3], 1 }
 0x259   :  { %594 = vsyncpa [#allocation3 + $0x1], 1 }
 0x25a   :  { %595 = vsyncpa [#allocation5], 1 }
 0x25b   :  { %597 = vsyncpa [#allocation5 + $0x1], 1 }

</bundles_post_ra>
